<compile_context>
chip_gen: v6e
topology: v6e:2x2x1
jax: 0.10.0
libtpu: 0.0.40
codegen_flags: <defaults>
</compile_context>

<pallas_src>
import functools
import numpy as np
import jax
import jax.numpy as jnp
from jax import lax
from jax.experimental import pallas as pl
from jax.experimental.pallas import tpu as pltpu


# --------------------------------------------------------------------------
# small helpers
# --------------------------------------------------------------------------
def _round_up(x, m):
    return ((x + m - 1) // m) * m


def _pad_to(x, shape):
    return jnp.pad(x, [(0, t - s) for s, t in zip(x.shape, shape)])


def _full_spec(shape):
    zeros = (0,) * len(shape)
    return pl.BlockSpec(shape, lambda *args, _z=zeros: _z)


_BLK = 8  # sublane block for the gather loops


# --------------------------------------------------------------------------
# Fused message-passing kernel (single launch up to atom_hiddens).
#   scalar prefetch (SMEM): a2b_flat (nA_p*K,), b2a (nB_p,)
#   VMEM inputs           : f_bonds(bf16), f_atoms(bf16), weights
#   VMEM scratch          : message(f32), input(f32), a_msg(f32), gathered(bf16)
# Bond rows are pre-shifted so that the reverse bond of row b is row b ^ 1.
# --------------------------------------------------------------------------
def _mpn_fused_kernel(a2b_ref, b2a_ref,
                      fb_ref, fa_ref, wi_ref, bi_ref,
                      wh_ref, bh_ref, woa_ref, wom_ref, bo_ref,
                      out_ref,
                      msg_ref, inp_ref, amsg_ref, gat_ref,
                      *, depth, K, n_atoms_p, n_bonds_p):
    f32 = jnp.float32
    bf16 = jnp.bfloat16

    # ---- input = W_i(f_bonds) ; message = relu(input) -----------------------
    inp = jnp.dot(fb_ref[...], wi_ref[...], preferred_element_type=f32) + bi_ref[...]
    inp_ref[...] = inp
    msg_ref[...] = jnp.maximum(inp, 0.0)

    # ---- a_msg[a] = (sum_k msg[a2b[a,k]]) * (max_k msg[a2b[a,k]]) -----------
    # blocked: 8 atoms per iteration, one (8, Hp) store.
    def atom_aggregate():
        def blk_body(t, carry):
            base = pl.multiple_of(t * _BLK, _BLK)
            rows = []
            for j in range(_BLK):                      # static unroll (8)
                a = base + j
                r = msg_ref[pl.ds(a2b_ref[a * K], 1), :]
                s = r
                mx = r
                for k in range(1, K):                  # K static & small
                    r = msg_ref[pl.ds(a2b_ref[a * K + k], 1), :]
                    s = s + r
                    mx = jnp.maximum(mx, r)
                rows.append(s * mx)
            amsg_ref[pl.ds(base, _BLK), :] = jnp.concatenate(rows, axis=0)
            return carry
        lax.fori_loop(0, n_atoms_p // _BLK, blk_body, 0)

    # ---- gathered[b] = a_msg[b2a[b]] - msg[b ^ 1]  (bf16 store) -------------
    # rev message = even/odd sublane swap of the contiguous 8-row msg block.
    def bond_gather():
        def blk_body(t, carry):
            base = pl.multiple_of(t * _BLK, _BLK)
            blk = msg_ref[pl.ds(base, _BLK), :]        # (8, Hp) contiguous load
            rev = jnp.concatenate(
                [blk[1:2], blk[0:1], blk[3:4], blk[2:3],
                 blk[5:6], blk[4:5], blk[7:8], blk[6:7]], axis=0)
            arows = []
            for j in range(_BLK):                      # static unroll (8)
                arows.append(amsg_ref[pl.ds(b2a_ref[base + j], 1), :])
            amsg_blk = jnp.concatenate(arows, axis=0)
            gat_ref[pl.ds(base, _BLK), :] = (amsg_blk - rev).astype(bf16)
            return carry
        lax.fori_loop(0, n_bonds_p // _BLK, blk_body, 0)

    # ---- depth - 1 message-update steps (Python-unrolled, depth is static) --
    for d in range(depth - 1):
        atom_aggregate()
        bond_gather()
        h = jnp.dot(gat_ref[...], wh_ref[d], preferred_element_type=f32) + bh_ref[d]
        msg_ref[...] = jnp.maximum(inp_ref[...] + h, 0.0)
        # dropout == identity in eval mode

    # ---- atom_hiddens = relu(W_o(concat([f_atoms, a_msg], -1))) -------------
    atom_aggregate()
    h = (jnp.dot(fa_ref[...], woa_ref[...], preferred_element_type=f32)
         + jnp.dot(amsg_ref[...].astype(bf16), wom_ref[...], preferred_element_type=f32)
         + bo_ref[...])
    out_ref[...] = jnp.maximum(h, 0.0)


# --------------------------------------------------------------------------
# Readout kernel: pad_sequence over a_scope.  Molecule atom rows are
# contiguous, so the body is one dynamic contiguous slice + iota mask + store.
# --------------------------------------------------------------------------
def _readout_kernel(starts_ref, sizes_ref, hid_ref, vec_ref, *, max_len_p):
    i = pl.program_id(0)
    start = starts_ref[i]
    size = sizes_ref[i]
    blk = hid_ref[pl.ds(start, max_len_p), :]                  # (max_len_p, Hp)
    row_ids = lax.broadcasted_iota(jnp.int32, (max_len_p, 1), 0)
    vec_ref[...] = jnp.where(row_ids < size, blk, 0.0)


# --------------------------------------------------------------------------
# Forward wrapper
# --------------------------------------------------------------------------
def mpn_encoder_forward(params, f_atoms, f_bonds, a2b, b2a, b2revb, a_scope, depth):
    n_atoms, atom_fdim = f_atoms.shape
    n_bonds, bond_fdim = f_bonds.shape
    K = a2b.shape[1]
    H = params["W_i"].shape[1]
    Hp = _round_up(H, 128)                          # lane-dense hidden dim

    # Verify chemprop's rev-bond pairing (bond 0 = padding, pairs (1,2),(3,4),..)
    # so the in-kernel even/odd swap after a 1-row shift is exactly message[b2revb].
    b2revb_np = np.asarray(b2revb).astype(np.int64)
    idx = np.arange(n_bonds, dtype=np.int64)
    expected_rev = np.where(idx == 0, 0, np.where(idx % 2 == 1, idx + 1, idx - 1))
    if not np.array_equal(b2revb_np, expected_rev):
        # TODO(synk): general b2revb fallback (scalar-indexed gather) for graphs
        # that do not follow the chemprop adjacent-pair convention.
        raise ValueError("b2revb does not follow the chemprop adjacent-pair convention")

    sizes = [int(s) for _, s in a_scope]
    starts = [int(s) for s, _ in a_scope]
    max_len = max(max(sizes), 1)
    max_len_p = _round_up(max_len, _BLK)            # sublane-dense readout store
    n_mols = len(a_scope)

    nA_p = _round_up(n_atoms + max_len_p, 16)       # headroom: readout slices in-bounds
    nB_p = _round_up(n_bonds + 1, 16)               # +1: bond rows shifted for pairing

    f32, bf16 = jnp.float32, jnp.bfloat16

    # ---- features: host-side bf16 cast; bond rows shifted by one ------------
    f_atoms_p = _pad_to(f_atoms.astype(f32), (nA_p, atom_fdim)).astype(bf16)
    f_bonds_s = jnp.concatenate([f_bonds[:1], f_bonds], axis=0)   # duplicate pad row 0
    f_bonds_p = _pad_to(f_bonds_s.astype(f32), (nB_p, bond_fdim)).astype(bf16)

    # ---- index tables (shifted); padding entries point at zero rows ---------
    a2b_flat = _pad_to(a2b.astype(jnp.int32) + 1, (nA_p, K)).reshape(-1)
    b2a_s = jnp.concatenate([b2a[:1], b2a], axis=0).astype(jnp.int32)
    b2a_p = _pad_to(b2a_s, (nB_p,))

    # ---- weights padded to Hp lanes; bf16 matmul operands, f32 biases -------
    W_i_p = _pad_to(params["W_i"], (bond_fdim, Hp)).astype(bf16)
    b_i_p = _pad_to(params["b_i"], (1, Hp)).astype(f32)
    wh_list, bh_list = [], []
    for d in range(depth - 1):
        wh_list.append(_pad_to(params[f"W_h_{d}"], (Hp, Hp)))
        bh_list.append(_pad_to(params[f"b_h_{d}"], (1, Hp)))
    if not wh_list:                                  # depth == 1 corner case
        wh_list = [jnp.zeros((Hp, Hp), f32)]
        bh_list = [jnp.zeros((1, Hp), f32)]
    W_h_stack = jnp.stack(wh_list).astype(bf16)      # (depth-1, Hp, Hp)
    b_h_stack = jnp.stack(bh_list).astype(f32)       # (depth-1, 1, Hp)
    W_o_atom_p = _pad_to(params["W_o_atom"], (atom_fdim, Hp)).astype(bf16)
    W_o_msg_p = _pad_to(params["W_o_msg"], (Hp, Hp)).astype(bf16)
    b_o_p = _pad_to(params["b_o"], (1, Hp)).astype(f32)

    regular_inputs = (f_bonds_p, f_atoms_p, W_i_p, b_i_p, W_h_stack, b_h_stack,
                      W_o_atom_p, W_o_msg_p, b_o_p)

    # ---- explicit VMEM budget -------------------------------------------------
    def _nbytes(x):
        return int(np.prod(x.shape)) * jnp.dtype(x.dtype).itemsize
    resident = (sum(_nbytes(x) for x in regular_inputs) * 2     # double-buffer slack
                + nA_p * Hp * 4 * 2                              # output
                + nB_p * Hp * 4 * 2                              # msg + input scratch
                + nA_p * Hp * 4                                  # a_msg scratch
                + nB_p * Hp * 2)                                 # gathered (bf16)
    vmem_limit = int(min(100 << 20, max(32 << 20, resident + (4 << 20))))

    # ---- fused message-passing kernel ----------------------------------------
    kernel = functools.partial(_mpn_fused_kernel, depth=depth, K=K,
                               n_atoms_p=nA_p, n_bonds_p=nB_p)
    grid_spec = pltpu.PrefetchScalarGridSpec(
        num_scalar_prefetch=2,
        grid=(1,),
        in_specs=[_full_spec(x.shape) for x in regular_inputs],
        out_specs=_full_spec((nA_p, Hp)),
        scratch_shapes=[
            pltpu.VMEM((nB_p, Hp), jnp.float32),    # message
            pltpu.VMEM((nB_p, Hp), jnp.float32),    # input (W_i projection)
            pltpu.VMEM((nA_p, Hp), jnp.float32),    # per-atom aggregated message
            pltpu.VMEM((nB_p, Hp), jnp.bfloat16),   # gathered bond message (W_h operand)
        ],
    )
    atom_hiddens_p = pl.pallas_call(
        kernel,
        out_shape=jax.ShapeDtypeStruct((nA_p, Hp), jnp.float32),
        grid_spec=grid_spec,
        compiler_params=pltpu.CompilerParams(
            dimension_semantics=("arbitrary",), vmem_limit_bytes=vmem_limit),
    )(a2b_flat, b2a_p, *regular_inputs)

    # ---- readout kernel (pad_sequence over a_scope) ---------------------------
    starts_arr = jnp.asarray(starts, jnp.int32)
    sizes_arr = jnp.asarray(sizes, jnp.int32)
    readout_grid = pltpu.PrefetchScalarGridSpec(
        num_scalar_prefetch=2,
        grid=(n_mols,),
        in_specs=[pl.BlockSpec((nA_p, Hp), lambda i, *_: (0, 0))],
        out_specs=pl.BlockSpec((None, max_len_p, Hp), lambda i, *_: (i, 0, 0)),
    )
    mol_vecs_p = pl.pallas_call(
        functools.partial(_readout_kernel, max_len_p=max_len_p),
        out_shape=jax.ShapeDtypeStruct((n_mols, max_len_p, Hp), jnp.float32),
        grid_spec=readout_grid,
        compiler_params=pltpu.CompilerParams(dimension_semantics=("parallel",)),
    )(starts_arr, sizes_arr, atom_hiddens_p)

    mol_mask = (jnp.arange(max_len, dtype=jnp.int32)[None, :]
                < sizes_arr[:, None]).astype(jnp.float32)

    atom_hiddens = atom_hiddens_p[:n_atoms, :H]
    mol_vecs = mol_vecs_p[:, :max_len, :H]
    return mol_vecs, mol_mask, atom_hiddens


# --------------------------------------------------------------------------
# Pure-JAX reference (uses the ORIGINAL, unshifted indices — also validates the
# host-side shift / even-odd-swap trick).  mm_dtype=bfloat16: matched-precision
# reference; mm_dtype=float32: nominal module semantics (looser check).
# --------------------------------------------------------------------------
def mpn_reference(params, f_atoms, f_bonds, a2b, b2a, b2revb, depth,
                  mm_dtype=jnp.float32):
    def mm(x, w):
        return jnp.dot(x.astype(mm_dtype), w.astype(mm_dtype),
                       preferred_element_type=jnp.float32)

    inp = mm(f_bonds, params["W_i"]) + params["b_i"]
    message = jnp.maximum(inp, 0.0)
    for d in range(depth - 1):
        nei = message[a2b]
        a_msg = nei.sum(1) * nei.max(1)
        message = a_msg[b2a] - message[b2revb]
        message = mm(message, params[f"W_h_{d}"]) + params[f"b_h_{d}"]
        message = jnp.maximum(inp + message, 0.0)
    nei = message[a2b]
    a_msg = nei.sum(1) * nei.max(1)
    h = (mm(f_atoms, params["W_o_atom"]) + mm(a_msg, params["W_o_msg"])
         + params["b_o"])
    return jnp.maximum(h, 0.0)


# --------------------------------------------------------------------------
# Deterministic parameter / graph construction
# --------------------------------------------------------------------------
def init_params(key, atom_fdim, bond_fdim, hidden, depth, bias=False):
    def linear(k, fan_in, fan_out, with_bias):
        k1, k2 = jax.random.split(k)
        bound = 1.0 / np.sqrt(fan_in)
        w = jax.random.uniform(k1, (fan_in, fan_out), jnp.float32, -bound, bound)
        b = (jax.random.uniform(k2, (1, fan_out), jnp.float32, -bound, bound)
             if with_bias else jnp.zeros((1, fan_out), jnp.float32))
        return w, b

    keys = jax.random.split(key, depth + 2)
    params = {}
    params["W_i"], params["b_i"] = linear(keys[0], bond_fdim, hidden, bias)
    for d in range(depth - 1):
        params[f"W_h_{d}"], params[f"b_h_{d}"] = linear(keys[1 + d], hidden, hidden, bias)
    w_o, b_o = linear(keys[depth], atom_fdim + hidden, hidden, True)
    params["W_o_atom"] = w_o[:atom_fdim]
    params["W_o_msg"] = w_o[atom_fdim:]
    params["b_o"] = b_o
    return params


def build_graph(atom_counts, edges_per_mol, atom_fdim, bond_fdim, key):
    # chemprop convention: atom 0 / bond 0 are zero padding rows.
    n_atoms = 1 + sum(atom_counts)
    edges = []
    offset = 1
    for count, mol_edges in zip(atom_counts, edges_per_mol):
        for (u, v) in mol_edges:
            edges.append((offset + u, offset + v))
        offset += count
    n_bonds = 1 + 2 * len(edges)
    b2a = np.zeros(n_bonds, np.int32)
    b2revb = np.zeros(n_bonds, np.int32)
    in_bonds = [[] for _ in range(n_atoms)]
    b = 1
    for (u, v) in edges:
        b2a[b] = u
        b2a[b + 1] = v
        b2revb[b] = b + 1
        b2revb[b + 1] = b
        in_bonds[v].append(b)
        in_bonds[u].append(b + 1)
        b += 2
    K = max(1, max(len(x) for x in in_bonds))
    a2b = np.zeros((n_atoms, K), np.int32)
    for a, lst in enumerate(in_bonds):
        a2b[a, :len(lst)] = lst

    k1, k2 = jax.random.split(key)
    f_atoms = jax.random.normal(k1, (n_atoms, atom_fdim), jnp.float32) * 0.5
    f_bonds = jax.random.normal(k2, (n_bonds, bond_fdim), jnp.float32) * 0.5
    f_atoms = f_atoms.at[0].set(0.0)
    f_bonds = f_bonds.at[0].set(0.0)

    a_scope = []
    start = 1
    for c in atom_counts:
        a_scope.append((start, c))
        start += c
    return f_atoms, f_bonds, jnp.asarray(a2b), jnp.asarray(b2a), jnp.asarray(b2revb), a_scope


if __name__ == "__main__":
    atom_fdim, bond_fdim, hidden, depth = 24, 40, 32, 3

    key = jax.random.PRNGKey(0)
    k_param, k_graph = jax.random.split(key)

    # Two small molecules: a 5-atom ring and a 4-atom chain.
    atom_counts = [5, 4]
    edges_per_mol = [
        [(0, 1), (1, 2), (2, 3), (3, 4), (4, 0)],   # ring
        [(0, 1), (1, 2), (2, 3)],                    # chain
    ]
    f_atoms, f_bonds, a2b, b2a, b2revb, a_scope = build_graph(
        atom_counts, edges_per_mol, atom_fdim, bond_fdim, k_graph)

    params = init_params(k_param, atom_fdim, bond_fdim, hidden, depth, bias=False)

    mol_vecs, mol_mask, atom_hiddens = mpn_encoder_forward(
        params, f_atoms, f_bonds, a2b, b2a, b2revb, a_scope, depth)
    jax.block_until_ready((mol_vecs, mol_mask, atom_hiddens))

    ref_bf16 = np.asarray(mpn_reference(params, f_atoms, f_bonds, a2b, b2a,
                                        b2revb, depth, mm_dtype=jnp.bfloat16))
    ref_f32 = np.asarray(mpn_reference(params, f_atoms, f_bonds, a2b, b2a,
                                       b2revb, depth, mm_dtype=jnp.float32))

    hid = np.asarray(atom_hiddens)
    assert mol_vecs.shape == (2, 5, hidden), mol_vecs.shape
    assert mol_mask.shape == (2, 5), mol_mask.shape
    assert np.allclose(hid, ref_bf16, rtol=2e-3, atol=2e-3), \
        "Pallas output mismatch vs matched-precision (bf16-operand) reference"
    assert np.allclose(hid, ref_f32, rtol=1e-1, atol=1e-1), \
        "Pallas output mismatch vs full-f32 reference"

    # readout / pad_sequence semantics
    mv = np.asarray(mol_vecs)
    mmsk = np.asarray(mol_mask)
    for i, (start, size) in enumerate(a_scope):
        assert np.allclose(mv[i, :size], hid[start:start + size], atol=1e-6)
        assert np.allclose(mv[i, size:], 0.0)
        assert np.allclose(mmsk[i], (np.arange(mv.shape[1]) < size).astype(np.float32))

    print("KERNEL_OK")
</pallas_src>

<mosaic_0001>
module attributes {stable_mosaic.version = 11 : i64} {
  func.func @_mpn_fused_kernel(%arg0: i32, %arg1: memref<64xi32, #tpu.memory_space<smem>>, %arg2: memref<32xi32, #tpu.memory_space<smem>>, %arg3: memref<32x40xbf16, #tpu.memory_space<vmem>>, %arg4: memref<32x24xbf16, #tpu.memory_space<vmem>>, %arg5: memref<40x128xbf16, #tpu.memory_space<vmem>>, %arg6: memref<1x128xf32, #tpu.memory_space<vmem>>, %arg7: memref<2x128x128xbf16, #tpu.memory_space<vmem>>, %arg8: memref<2x1x128xf32, #tpu.memory_space<vmem>>, %arg9: memref<24x128xbf16, #tpu.memory_space<vmem>>, %arg10: memref<128x128xbf16, #tpu.memory_space<vmem>>, %arg11: memref<1x128xf32, #tpu.memory_space<vmem>>, %arg12: memref<32x128xf32, #tpu.memory_space<vmem>>, %arg13: memref<32x128xf32, #tpu.memory_space<vmem>>, %arg14: memref<32x128xf32, #tpu.memory_space<vmem>>, %arg15: memref<32x128xf32, #tpu.memory_space<vmem>>, %arg16: memref<32x128xbf16, #tpu.memory_space<vmem>>) attributes {dimension_semantics = [#tpu.dimension_semantics<arbitrary>], iteration_bounds = array<i64: 1>, scalar_prefetch = 2 : i64, scratch_operands = 4 : i64, tpu.core_type = #tpu.core_type<tc>, window_params = [{pipeline_mode = #tpu.pipeline_mode<synchronous>, transform_indices = @transform_0, window_bounds = array<i64: 32, 40>}, {pipeline_mode = #tpu.pipeline_mode<synchronous>, transform_indices = @transform_1, window_bounds = array<i64: 32, 24>}, {pipeline_mode = #tpu.pipeline_mode<synchronous>, transform_indices = @transform_2, window_bounds = array<i64: 40, 128>}, {pipeline_mode = #tpu.pipeline_mode<synchronous>, transform_indices = @transform_3, window_bounds = array<i64: 1, 128>}, {pipeline_mode = #tpu.pipeline_mode<synchronous>, transform_indices = @transform_4, window_bounds = array<i64: 2, 128, 128>}, {pipeline_mode = #tpu.pipeline_mode<synchronous>, transform_indices = @transform_5, window_bounds = array<i64: 2, 1, 128>}, {pipeline_mode = #tpu.pipeline_mode<synchronous>, transform_indices = @transform_6, window_bounds = array<i64: 24, 128>}, {pipeline_mode = #tpu.pipeline_mode<synchronous>, transform_indices = @transform_7, window_bounds = array<i64: 128, 128>}, {pipeline_mode = #tpu.pipeline_mode<synchronous>, transform_indices = @transform_8, window_bounds = array<i64: 1, 128>}, {pipeline_mode = #tpu.pipeline_mode<synchronous>, transform_indices = @transform_9, window_bounds = array<i64: 32, 128>}]} {
    %c0 = arith.constant 0 : index
    %c0_0 = arith.constant 0 : index
    %0 = vector.load %arg3[%c0, %c0_0] : memref<32x40xbf16, #tpu.memory_space<vmem>>, vector<32x40xbf16>
    %c0_1 = arith.constant 0 : index
    %c0_2 = arith.constant 0 : index
    %1 = vector.load %arg5[%c0_1, %c0_2] : memref<40x128xbf16, #tpu.memory_space<vmem>>, vector<40x128xbf16>
    %cst = arith.constant dense<0.000000e+00> : vector<32x128xf32>
    %2 = tpu.matmul %0, %1, %cst {dimension_numbers = #tpu.dot_dimension_numbers<[1], [0], [0], [1], [0, 0, 1, 1], [], []>} : vector<32x40xbf16>, vector<40x128xbf16>, vector<32x128xf32> -> vector<32x128xf32>
    %c0_3 = arith.constant 0 : index
    %c0_4 = arith.constant 0 : index
    %3 = vector.load %arg6[%c0_3, %c0_4] : memref<1x128xf32, #tpu.memory_space<vmem>>, vector<1x128xf32>
    %4 = vector.broadcast %3 : vector<1x128xf32> to vector<32x128xf32>
    %5 = arith.addf %2, %4 : vector<32x128xf32>
    %c0_5 = arith.constant 0 : index
    %c0_6 = arith.constant 0 : index
    %6 = vector.load %arg14[%c0_5, %c0_6] : memref<32x128xf32, #tpu.memory_space<vmem>>, vector<32x128xf32>
    tpu.vector_store %arg14[%c0_5, %c0_6], %5 {strides = array<i32>} : memref<32x128xf32, #tpu.memory_space<vmem>>, vector<32x128xf32>,
    %cst_7 = arith.constant 0.000000e+00 : f32
    %7 = vector.broadcast %cst_7 : f32 to vector<32x128xf32>
    %8 = arith.maximumf %5, %7 : vector<32x128xf32>
    %c0_8 = arith.constant 0 : index
    %c0_9 = arith.constant 0 : index
    %9 = vector.load %arg13[%c0_8, %c0_9] : memref<32x128xf32, #tpu.memory_space<vmem>>, vector<32x128xf32>
    tpu.vector_store %arg13[%c0_8, %c0_9], %8 {strides = array<i32>} : memref<32x128xf32, #tpu.memory_space<vmem>>, vector<32x128xf32>,
    %c0_i32 = arith.constant 0 : i32
    %c4_i32 = arith.constant 4 : i32
    %10 = arith.addi %c0_i32, %c4_i32 : i32
    %c1_i32 = arith.constant 1 : i32
    scf.for %arg17 = %c0_i32 to %10 step %c1_i32  : i32 {
      %c8_i32 = arith.constant 8 : i32
      %55 = arith.muli %arg17, %c8_i32 : i32
      %56 = tpu.assume_multiple %55, 8 : i32
      %c0_i32_69 = arith.constant 0 : i32
      %57 = arith.addi %56, %c0_i32_69 : i32
      %c2_i32 = arith.constant 2 : i32
      %58 = arith.muli %57, %c2_i32 : i32
      %59 = arith.index_cast %58 : i32 to index
      %60 = memref.load %arg1[%59] : memref<64xi32, #tpu.memory_space<smem>>
      %61 = arith.index_cast %60 : i32 to index
      %c0_70 = arith.constant 0 : index
      %62 = vector.load %arg13[%61, %c0_70] : memref<32x128xf32, #tpu.memory_space<vmem>>, vector<1x128xf32>
      %c2_i32_71 = arith.constant 2 : i32
      %63 = arith.muli %57, %c2_i32_71 : i32
      %c1_i32_72 = arith.constant 1 : i32
      %64 = arith.addi %63, %c1_i32_72 : i32
      %65 = arith.index_cast %64 : i32 to index
      %66 = memref.load %arg1[%65] : memref<64xi32, #tpu.memory_space<smem>>
      %67 = arith.index_cast %66 : i32 to index
      %c0_73 = arith.constant 0 : index
      %68 = vector.load %arg13[%67, %c0_73] : memref<32x128xf32, #tpu.memory_space<vmem>>, vector<1x128xf32>
      %69 = arith.addf %62, %68 : vector<1x128xf32>
      %70 = arith.maximumf %62, %68 : vector<1x128xf32>
      %71 = arith.mulf %69, %70 : vector<1x128xf32>
      %c1_i32_74 = arith.constant 1 : i32
      %72 = arith.addi %56, %c1_i32_74 : i32
      %c2_i32_75 = arith.constant 2 : i32
      %73 = arith.muli %72, %c2_i32_75 : i32
      %74 = arith.index_cast %73 : i32 to index
      %75 = memref.load %arg1[%74] : memref<64xi32, #tpu.memory_space<smem>>
      %76 = arith.index_cast %75 : i32 to index
      %c0_76 = arith.constant 0 : index
      %77 = vector.load %arg13[%76, %c0_76] : memref<32x128xf32, #tpu.memory_space<vmem>>, vector<1x128xf32>
      %c2_i32_77 = arith.constant 2 : i32
      %78 = arith.muli %72, %c2_i32_77 : i32
      %c1_i32_78 = arith.constant 1 : i32
      %79 = arith.addi %78, %c1_i32_78 : i32
      %80 = arith.index_cast %79 : i32 to index
      %81 = memref.load %arg1[%80] : memref<64xi32, #tpu.memory_space<smem>>
      %82 = arith.index_cast %81 : i32 to index
      %c0_79 = arith.constant 0 : index
      %83 = vector.load %arg13[%82, %c0_79] : memref<32x128xf32, #tpu.memory_space<vmem>>, vector<1x128xf32>
      %84 = arith.addf %77, %83 : vector<1x128xf32>
      %85 = arith.maximumf %77, %83 : vector<1x128xf32>
      %86 = arith.mulf %84, %85 : vector<1x128xf32>
      %c2_i32_80 = arith.constant 2 : i32
      %87 = arith.addi %56, %c2_i32_80 : i32
      %c2_i32_81 = arith.constant 2 : i32
      %88 = arith.muli %87, %c2_i32_81 : i32
      %89 = arith.index_cast %88 : i32 to index
      %90 = memref.load %arg1[%89] : memref<64xi32, #tpu.memory_space<smem>>
      %91 = arith.index_cast %90 : i32 to index
      %c0_82 = arith.constant 0 : index
      %92 = vector.load %arg13[%91, %c0_82] : memref<32x128xf32, #tpu.memory_space<vmem>>, vector<1x128xf32>
      %c2_i32_83 = arith.constant 2 : i32
      %93 = arith.muli %87, %c2_i32_83 : i32
      %c1_i32_84 = arith.constant 1 : i32
      %94 = arith.addi %93, %c1_i32_84 : i32
      %95 = arith.index_cast %94 : i32 to index
      %96 = memref.load %arg1[%95] : memref<64xi32, #tpu.memory_space<smem>>
      %97 = arith.index_cast %96 : i32 to index
      %c0_85 = arith.constant 0 : index
      %98 = vector.load %arg13[%97, %c0_85] : memref<32x128xf32, #tpu.memory_space<vmem>>, vector<1x128xf32>
      %99 = arith.addf %92, %98 : vector<1x128xf32>
      %100 = arith.maximumf %92, %98 : vector<1x128xf32>
      %101 = arith.mulf %99, %100 : vector<1x128xf32>
      %c3_i32 = arith.constant 3 : i32
      %102 = arith.addi %56, %c3_i32 : i32
      %c2_i32_86 = arith.constant 2 : i32
      %103 = arith.muli %102, %c2_i32_86 : i32
      %104 = arith.index_cast %103 : i32 to index
      %105 = memref.load %arg1[%104] : memref<64xi32, #tpu.memory_space<smem>>
      %106 = arith.index_cast %105 : i32 to index
      %c0_87 = arith.constant 0 : index
      %107 = vector.load %arg13[%106, %c0_87] : memref<32x128xf32, #tpu.memory_space<vmem>>, vector<1x128xf32>
      %c2_i32_88 = arith.constant 2 : i32
      %108 = arith.muli %102, %c2_i32_88 : i32
      %c1_i32_89 = arith.constant 1 : i32
      %109 = arith.addi %108, %c1_i32_89 : i32
      %110 = arith.index_cast %109 : i32 to index
      %111 = memref.load %arg1[%110] : memref<64xi32, #tpu.memory_space<smem>>
      %112 = arith.index_cast %111 : i32 to index
      %c0_90 = arith.constant 0 : index
      %113 = vector.load %arg13[%112, %c0_90] : memref<32x128xf32, #tpu.memory_space<vmem>>, vector<1x128xf32>
      %114 = arith.addf %107, %113 : vector<1x128xf32>
      %115 = arith.maximumf %107, %113 : vector<1x128xf32>
      %116 = arith.mulf %114, %115 : vector<1x128xf32>
      %c4_i32_91 = arith.constant 4 : i32
      %117 = arith.addi %56, %c4_i32_91 : i32
      %c2_i32_92 = arith.constant 2 : i32
      %118 = arith.muli %117, %c2_i32_92 : i32
      %119 = arith.index_cast %118 : i32 to index
      %120 = memref.load %arg1[%119] : memref<64xi32, #tpu.memory_space<smem>>
      %121 = arith.index_cast %120 : i32 to index
      %c0_93 = arith.constant 0 : index
      %122 = vector.load %arg13[%121, %c0_93] : memref<32x128xf32, #tpu.memory_space<vmem>>, vector<1x128xf32>
      %c2_i32_94 = arith.constant 2 : i32
      %123 = arith.muli %117, %c2_i32_94 : i32
      %c1_i32_95 = arith.constant 1 : i32
      %124 = arith.addi %123, %c1_i32_95 : i32
      %125 = arith.index_cast %124 : i32 to index
      %126 = memref.load %arg1[%125] : memref<64xi32, #tpu.memory_space<smem>>
      %127 = arith.index_cast %126 : i32 to index
      %c0_96 = arith.constant 0 : index
      %128 = vector.load %arg13[%127, %c0_96] : memref<32x128xf32, #tpu.memory_space<vmem>>, vector<1x128xf32>
      %129 = arith.addf %122, %128 : vector<1x128xf32>
      %130 = arith.maximumf %122, %128 : vector<1x128xf32>
      %131 = arith.mulf %129, %130 : vector<1x128xf32>
      %c5_i32 = arith.constant 5 : i32
      %132 = arith.addi %56, %c5_i32 : i32
      %c2_i32_97 = arith.constant 2 : i32
      %133 = arith.muli %132, %c2_i32_97 : i32
      %134 = arith.index_cast %133 : i32 to index
      %135 = memref.load %arg1[%134] : memref<64xi32, #tpu.memory_space<smem>>
      %136 = arith.index_cast %135 : i32 to index
      %c0_98 = arith.constant 0 : index
      %137 = vector.load %arg13[%136, %c0_98] : memref<32x128xf32, #tpu.memory_space<vmem>>, vector<1x128xf32>
      %c2_i32_99 = arith.constant 2 : i32
      %138 = arith.muli %132, %c2_i32_99 : i32
      %c1_i32_100 = arith.constant 1 : i32
      %139 = arith.addi %138, %c1_i32_100 : i32
      %140 = arith.index_cast %139 : i32 to index
      %141 = memref.load %arg1[%140] : memref<64xi32, #tpu.memory_space<smem>>
      %142 = arith.index_cast %141 : i32 to index
      %c0_101 = arith.constant 0 : index
      %143 = vector.load %arg13[%142, %c0_101] : memref<32x128xf32, #tpu.memory_space<vmem>>, vector<1x128xf32>
      %144 = arith.addf %137, %143 : vector<1x128xf32>
      %145 = arith.maximumf %137, %143 : vector<1x128xf32>
      %146 = arith.mulf %144, %145 : vector<1x128xf32>
      %c6_i32 = arith.constant 6 : i32
      %147 = arith.addi %56, %c6_i32 : i32
      %c2_i32_102 = arith.constant 2 : i32
      %148 = arith.muli %147, %c2_i32_102 : i32
      %149 = arith.index_cast %148 : i32 to index
      %150 = memref.load %arg1[%149] : memref<64xi32, #tpu.memory_space<smem>>
      %151 = arith.index_cast %150 : i32 to index
      %c0_103 = arith.constant 0 : index
      %152 = vector.load %arg13[%151, %c0_103] : memref<32x128xf32, #tpu.memory_space<vmem>>, vector<1x128xf32>
      %c2_i32_104 = arith.constant 2 : i32
      %153 = arith.muli %147, %c2_i32_104 : i32
      %c1_i32_105 = arith.constant 1 : i32
      %154 = arith.addi %153, %c1_i32_105 : i32
      %155 = arith.index_cast %154 : i32 to index
      %156 = memref.load %arg1[%155] : memref<64xi32, #tpu.memory_space<smem>>
      %157 = arith.index_cast %156 : i32 to index
      %c0_106 = arith.constant 0 : index
      %158 = vector.load %arg13[%157, %c0_106] : memref<32x128xf32, #tpu.memory_space<vmem>>, vector<1x128xf32>
      %159 = arith.addf %152, %158 : vector<1x128xf32>
      %160 = arith.maximumf %152, %158 : vector<1x128xf32>
      %161 = arith.mulf %159, %160 : vector<1x128xf32>
      %c7_i32 = arith.constant 7 : i32
      %162 = arith.addi %56, %c7_i32 : i32
      %c2_i32_107 = arith.constant 2 : i32
      %163 = arith.muli %162, %c2_i32_107 : i32
      %164 = arith.index_cast %163 : i32 to index
      %165 = memref.load %arg1[%164] : memref<64xi32, #tpu.memory_space<smem>>
      %166 = arith.index_cast %165 : i32 to index
      %c0_108 = arith.constant 0 : index
      %167 = vector.load %arg13[%166, %c0_108] : memref<32x128xf32, #tpu.memory_space<vmem>>, vector<1x128xf32>
      %c2_i32_109 = arith.constant 2 : i32
      %168 = arith.muli %162, %c2_i32_109 : i32
      %c1_i32_110 = arith.constant 1 : i32
      %169 = arith.addi %168, %c1_i32_110 : i32
      %170 = arith.index_cast %169 : i32 to index
      %171 = memref.load %arg1[%170] : memref<64xi32, #tpu.memory_space<smem>>
      %172 = arith.index_cast %171 : i32 to index
      %c0_111 = arith.constant 0 : index
      %173 = vector.load %arg13[%172, %c0_111] : memref<32x128xf32, #tpu.memory_space<vmem>>, vector<1x128xf32>
      %174 = arith.addf %167, %173 : vector<1x128xf32>
      %175 = arith.maximumf %167, %173 : vector<1x128xf32>
      %176 = arith.mulf %174, %175 : vector<1x128xf32>
      %177 = tpu.concatenate %71, %86, %101, %116, %131, %146, %161, %176 in 0 : vector<1x128xf32>, vector<1x128xf32>, vector<1x128xf32>, vector<1x128xf32>, vector<1x128xf32>, vector<1x128xf32>, vector<1x128xf32>, vector<1x128xf32> -> vector<8x128xf32>
      %178 = arith.index_cast %56 : i32 to index
      %c0_112 = arith.constant 0 : index
      %179 = vector.load %arg15[%178, %c0_112] : memref<32x128xf32, #tpu.memory_space<vmem>>, vector<8x128xf32>
      tpu.vector_store %arg15[%178, %c0_112], %177 {strides = array<i32>} : memref<32x128xf32, #tpu.memory_space<vmem>>, vector<8x128xf32>,
    }
    %c4_i32_10 = arith.constant 4 : i32
    %c0_i32_11 = arith.constant 0 : i32
    %c4_i32_12 = arith.constant 4 : i32
    %11 = arith.addi %c0_i32_11, %c4_i32_12 : i32
    %c1_i32_13 = arith.constant 1 : i32
    scf.for %arg17 = %c0_i32_11 to %11 step %c1_i32_13  : i32 {
      %c8_i32 = arith.constant 8 : i32
      %55 = arith.muli %arg17, %c8_i32 : i32
      %56 = tpu.assume_multiple %55, 8 : i32
      %57 = arith.index_cast %56 : i32 to index
      %c0_69 = arith.constant 0 : index
      %58 = vector.load %arg13[%57, %c0_69] : memref<32x128xf32, #tpu.memory_space<vmem>>, vector<8x128xf32>
      %59 = vector.extract_strided_slice %58 {offsets = [1, 0], sizes = [1, 128], strides = [1, 1]} : vector<8x128xf32> to vector<1x128xf32>
      %60 = vector.extract_strided_slice %58 {offsets = [0, 0], sizes = [1, 128], strides = [1, 1]} : vector<8x128xf32> to vector<1x128xf32>
      %61 = vector.extract_strided_slice %58 {offsets = [3, 0], sizes = [1, 128], strides = [1, 1]} : vector<8x128xf32> to vector<1x128xf32>
      %62 = vector.extract_strided_slice %58 {offsets = [2, 0], sizes = [1, 128], strides = [1, 1]} : vector<8x128xf32> to vector<1x128xf32>
      %63 = vector.extract_strided_slice %58 {offsets = [5, 0], sizes = [1, 128], strides = [1, 1]} : vector<8x128xf32> to vector<1x128xf32>
      %64 = vector.extract_strided_slice %58 {offsets = [4, 0], sizes = [1, 128], strides = [1, 1]} : vector<8x128xf32> to vector<1x128xf32>
      %65 = vector.extract_strided_slice %58 {offsets = [7, 0], sizes = [1, 128], strides = [1, 1]} : vector<8x128xf32> to vector<1x128xf32>
      %66 = vector.extract_strided_slice %58 {offsets = [6, 0], sizes = [1, 128], strides = [1, 1]} : vector<8x128xf32> to vector<1x128xf32>
      %67 = tpu.concatenate %59, %60, %61, %62, %63, %64, %65, %66 in 0 : vector<1x128xf32>, vector<1x128xf32>, vector<1x128xf32>, vector<1x128xf32>, vector<1x128xf32>, vector<1x128xf32>, vector<1x128xf32>, vector<1x128xf32> -> vector<8x128xf32>
      %c0_i32_70 = arith.constant 0 : i32
      %68 = arith.addi %56, %c0_i32_70 : i32
      %69 = arith.index_cast %68 : i32 to index
      %70 = memref.load %arg2[%69] : memref<32xi32, #tpu.memory_space<smem>>
      %71 = arith.index_cast %70 : i32 to index
      %c0_71 = arith.constant 0 : index
      %72 = vector.load %arg15[%71, %c0_71] : memref<32x128xf32, #tpu.memory_space<vmem>>, vector<1x128xf32>
      %c1_i32_72 = arith.constant 1 : i32
      %73 = arith.addi %56, %c1_i32_72 : i32
      %74 = arith.index_cast %73 : i32 to index
      %75 = memref.load %arg2[%74] : memref<32xi32, #tpu.memory_space<smem>>
      %76 = arith.index_cast %75 : i32 to index
      %c0_73 = arith.constant 0 : index
      %77 = vector.load %arg15[%76, %c0_73] : memref<32x128xf32, #tpu.memory_space<vmem>>, vector<1x128xf32>
      %c2_i32 = arith.constant 2 : i32
      %78 = arith.addi %56, %c2_i32 : i32
      %79 = arith.index_cast %78 : i32 to index
      %80 = memref.load %arg2[%79] : memref<32xi32, #tpu.memory_space<smem>>
      %81 = arith.index_cast %80 : i32 to index
      %c0_74 = arith.constant 0 : index
      %82 = vector.load %arg15[%81, %c0_74] : memref<32x128xf32, #tpu.memory_space<vmem>>, vector<1x128xf32>
      %c3_i32 = arith.constant 3 : i32
      %83 = arith.addi %56, %c3_i32 : i32
      %84 = arith.index_cast %83 : i32 to index
      %85 = memref.load %arg2[%84] : memref<32xi32, #tpu.memory_space<smem>>
      %86 = arith.index_cast %85 : i32 to index
      %c0_75 = arith.constant 0 : index
      %87 = vector.load %arg15[%86, %c0_75] : memref<32x128xf32, #tpu.memory_space<vmem>>, vector<1x128xf32>
      %c4_i32_76 = arith.constant 4 : i32
      %88 = arith.addi %56, %c4_i32_76 : i32
      %89 = arith.index_cast %88 : i32 to index
      %90 = memref.load %arg2[%89] : memref<32xi32, #tpu.memory_space<smem>>
      %91 = arith.index_cast %90 : i32 to index
      %c0_77 = arith.constant 0 : index
      %92 = vector.load %arg15[%91, %c0_77] : memref<32x128xf32, #tpu.memory_space<vmem>>, vector<1x128xf32>
      %c5_i32 = arith.constant 5 : i32
      %93 = arith.addi %56, %c5_i32 : i32
      %94 = arith.index_cast %93 : i32 to index
      %95 = memref.load %arg2[%94] : memref<32xi32, #tpu.memory_space<smem>>
      %96 = arith.index_cast %95 : i32 to index
      %c0_78 = arith.constant 0 : index
      %97 = vector.load %arg15[%96, %c0_78] : memref<32x128xf32, #tpu.memory_space<vmem>>, vector<1x128xf32>
      %c6_i32 = arith.constant 6 : i32
      %98 = arith.addi %56, %c6_i32 : i32
      %99 = arith.index_cast %98 : i32 to index
      %100 = memref.load %arg2[%99] : memref<32xi32, #tpu.memory_space<smem>>
      %101 = arith.index_cast %100 : i32 to index
      %c0_79 = arith.constant 0 : index
      %102 = vector.load %arg15[%101, %c0_79] : memref<32x128xf32, #tpu.memory_space<vmem>>, vector<1x128xf32>
      %c7_i32 = arith.constant 7 : i32
      %103 = arith.addi %56, %c7_i32 : i32
      %104 = arith.index_cast %103 : i32 to index
      %105 = memref.load %arg2[%104] : memref<32xi32, #tpu.memory_space<smem>>
      %106 = arith.index_cast %105 : i32 to index
      %c0_80 = arith.constant 0 : index
      %107 = vector.load %arg15[%106, %c0_80] : memref<32x128xf32, #tpu.memory_space<vmem>>, vector<1x128xf32>
      %108 = tpu.concatenate %72, %77, %82, %87, %92, %97, %102, %107 in 0 : vector<1x128xf32>, vector<1x128xf32>, vector<1x128xf32>, vector<1x128xf32>, vector<1x128xf32>, vector<1x128xf32>, vector<1x128xf32>, vector<1x128xf32> -> vector<8x128xf32>
      %109 = arith.subf %108, %67 : vector<8x128xf32>
      %110 = arith.truncf %109 : vector<8x128xf32> to vector<8x128xbf16>
      %111 = arith.index_cast %56 : i32 to index
      %c0_81 = arith.constant 0 : index
      %112 = vector.load %arg16[%111, %c0_81] : memref<32x128xbf16, #tpu.memory_space<vmem>>, vector<8x128xbf16>
      tpu.vector_store %arg16[%111, %c0_81], %110 {strides = array<i32>} : memref<32x128xbf16, #tpu.memory_space<vmem>>, vector<8x128xbf16>,
    }
    %c4_i32_14 = arith.constant 4 : i32
    %c0_15 = arith.constant 0 : index
    %c0_16 = arith.constant 0 : index
    %12 = vector.load %arg16[%c0_15, %c0_16] : memref<32x128xbf16, #tpu.memory_space<vmem>>, vector<32x128xbf16>
    %c0_17 = arith.constant 0 : index
    %c0_18 = arith.constant 0 : index
    %c0_19 = arith.constant 0 : index
    %13 = vector.load %arg7[%c0_17, %c0_18, %c0_19] : memref<2x128x128xbf16, #tpu.memory_space<vmem>>, vector<1x128x128xbf16>
    %14 = vector.shape_cast %13 : vector<1x128x128xbf16> to vector<128x128xbf16>
    %cst_20 = arith.constant dense<0.000000e+00> : vector<32x128xf32>
    %15 = tpu.matmul %12, %14, %cst_20 {dimension_numbers = #tpu.dot_dimension_numbers<[1], [0], [0], [1], [0, 0, 1, 1], [], []>} : vector<32x128xbf16>, vector<128x128xbf16>, vector<32x128xf32> -> vector<32x128xf32>
    %c0_21 = arith.constant 0 : index
    %c0_22 = arith.constant 0 : index
    %c0_23 = arith.constant 0 : index
    %16 = vector.load %arg8[%c0_21, %c0_22, %c0_23] : memref<2x1x128xf32, #tpu.memory_space<vmem>>, vector<1x1x128xf32>
    %17 = vector.shape_cast %16 : vector<1x1x128xf32> to vector<1x128xf32>
    %18 = vector.broadcast %17 : vector<1x128xf32> to vector<32x128xf32>
    %19 = arith.addf %15, %18 : vector<32x128xf32>
    %c0_24 = arith.constant 0 : index
    %c0_25 = arith.constant 0 : index
    %20 = vector.load %arg14[%c0_24, %c0_25] : memref<32x128xf32, #tpu.memory_space<vmem>>, vector<32x128xf32>
    %21 = arith.addf %20, %19 : vector<32x128xf32>
    %cst_26 = arith.constant 0.000000e+00 : f32
    %22 = vector.broadcast %cst_26 : f32 to vector<32x128xf32>
    %23 = arith.maximumf %21, %22 : vector<32x128xf32>
    %c0_27 = arith.constant 0 : index
    %c0_28 = arith.constant 0 : index
    %24 = vector.load %arg13[%c0_27, %c0_28] : memref<32x128xf32, #tpu.memory_space<vmem>>, vector<32x128xf32>
    tpu.vector_store %arg13[%c0_27, %c0_28], %23 {strides = array<i32>} : memref<32x128xf32, #tpu.memory_space<vmem>>, vector<32x128xf32>,
    %c0_i32_29 = arith.constant 0 : i32
    %c4_i32_30 = arith.constant 4 : i32
    %25 = arith.addi %c0_i32_29, %c4_i32_30 : i32
    %c1_i32_31 = arith.constant 1 : i32
    scf.for %arg17 = %c0_i32_29 to %25 step %c1_i32_31  : i32 {
      %c8_i32 = arith.constant 8 : i32
      %55 = arith.muli %arg17, %c8_i32 : i32
      %56 = tpu.assume_multiple %55, 8 : i32
      %c0_i32_69 = arith.constant 0 : i32
      %57 = arith.addi %56, %c0_i32_69 : i32
      %c2_i32 = arith.constant 2 : i32
      %58 = arith.muli %57, %c2_i32 : i32
      %59 = arith.index_cast %58 : i32 to index
      %60 = memref.load %arg1[%59] : memref<64xi32, #tpu.memory_space<smem>>
      %61 = arith.index_cast %60 : i32 to index
      %c0_70 = arith.constant 0 : index
      %62 = vector.load %arg13[%61, %c0_70] : memref<32x128xf32, #tpu.memory_space<vmem>>, vector<1x128xf32>
      %c2_i32_71 = arith.constant 2 : i32
      %63 = arith.muli %57, %c2_i32_71 : i32
      %c1_i32_72 = arith.constant 1 : i32
      %64 = arith.addi %63, %c1_i32_72 : i32
      %65 = arith.index_cast %64 : i32 to index
      %66 = memref.load %arg1[%65] : memref<64xi32, #tpu.memory_space<smem>>
      %67 = arith.index_cast %66 : i32 to index
      %c0_73 = arith.constant 0 : index
      %68 = vector.load %arg13[%67, %c0_73] : memref<32x128xf32, #tpu.memory_space<vmem>>, vector<1x128xf32>
      %69 = arith.addf %62, %68 : vector<1x128xf32>
      %70 = arith.maximumf %62, %68 : vector<1x128xf32>
      %71 = arith.mulf %69, %70 : vector<1x128xf32>
      %c1_i32_74 = arith.constant 1 : i32
      %72 = arith.addi %56, %c1_i32_74 : i32
      %c2_i32_75 = arith.constant 2 : i32
      %73 = arith.muli %72, %c2_i32_75 : i32
      %74 = arith.index_cast %73 : i32 to index
      %75 = memref.load %arg1[%74] : memref<64xi32, #tpu.memory_space<smem>>
      %76 = arith.index_cast %75 : i32 to index
      %c0_76 = arith.constant 0 : index
      %77 = vector.load %arg13[%76, %c0_76] : memref<32x128xf32, #tpu.memory_space<vmem>>, vector<1x128xf32>
      %c2_i32_77 = arith.constant 2 : i32
      %78 = arith.muli %72, %c2_i32_77 : i32
      %c1_i32_78 = arith.constant 1 : i32
      %79 = arith.addi %78, %c1_i32_78 : i32
      %80 = arith.index_cast %79 : i32 to index
      %81 = memref.load %arg1[%80] : memref<64xi32, #tpu.memory_space<smem>>
      %82 = arith.index_cast %81 : i32 to index
      %c0_79 = arith.constant 0 : index
      %83 = vector.load %arg13[%82, %c0_79] : memref<32x128xf32, #tpu.memory_space<vmem>>, vector<1x128xf32>
      %84 = arith.addf %77, %83 : vector<1x128xf32>
      %85 = arith.maximumf %77, %83 : vector<1x128xf32>
      %86 = arith.mulf %84, %85 : vector<1x128xf32>
      %c2_i32_80 = arith.constant 2 : i32
      %87 = arith.addi %56, %c2_i32_80 : i32
      %c2_i32_81 = arith.constant 2 : i32
      %88 = arith.muli %87, %c2_i32_81 : i32
      %89 = arith.index_cast %88 : i32 to index
      %90 = memref.load %arg1[%89] : memref<64xi32, #tpu.memory_space<smem>>
      %91 = arith.index_cast %90 : i32 to index
      %c0_82 = arith.constant 0 : index
      %92 = vector.load %arg13[%91, %c0_82] : memref<32x128xf32, #tpu.memory_space<vmem>>, vector<1x128xf32>
      %c2_i32_83 = arith.constant 2 : i32
      %93 = arith.muli %87, %c2_i32_83 : i32
      %c1_i32_84 = arith.constant 1 : i32
      %94 = arith.addi %93, %c1_i32_84 : i32
      %95 = arith.index_cast %94 : i32 to index
      %96 = memref.load %arg1[%95] : memref<64xi32, #tpu.memory_space<smem>>
      %97 = arith.index_cast %96 : i32 to index
      %c0_85 = arith.constant 0 : index
      %98 = vector.load %arg13[%97, %c0_85] : memref<32x128xf32, #tpu.memory_space<vmem>>, vector<1x128xf32>
      %99 = arith.addf %92, %98 : vector<1x128xf32>
      %100 = arith.maximumf %92, %98 : vector<1x128xf32>
      %101 = arith.mulf %99, %100 : vector<1x128xf32>
      %c3_i32 = arith.constant 3 : i32
      %102 = arith.addi %56, %c3_i32 : i32
      %c2_i32_86 = arith.constant 2 : i32
      %103 = arith.muli %102, %c2_i32_86 : i32
      %104 = arith.index_cast %103 : i32 to index
      %105 = memref.load %arg1[%104] : memref<64xi32, #tpu.memory_space<smem>>
      %106 = arith.index_cast %105 : i32 to index
      %c0_87 = arith.constant 0 : index
      %107 = vector.load %arg13[%106, %c0_87] : memref<32x128xf32, #tpu.memory_space<vmem>>, vector<1x128xf32>
      %c2_i32_88 = arith.constant 2 : i32
      %108 = arith.muli %102, %c2_i32_88 : i32
      %c1_i32_89 = arith.constant 1 : i32
      %109 = arith.addi %108, %c1_i32_89 : i32
      %110 = arith.index_cast %109 : i32 to index
      %111 = memref.load %arg1[%110] : memref<64xi32, #tpu.memory_space<smem>>
      %112 = arith.index_cast %111 : i32 to index
      %c0_90 = arith.constant 0 : index
      %113 = vector.load %arg13[%112, %c0_90] : memref<32x128xf32, #tpu.memory_space<vmem>>, vector<1x128xf32>
      %114 = arith.addf %107, %113 : vector<1x128xf32>
      %115 = arith.maximumf %107, %113 : vector<1x128xf32>
      %116 = arith.mulf %114, %115 : vector<1x128xf32>
      %c4_i32_91 = arith.constant 4 : i32
      %117 = arith.addi %56, %c4_i32_91 : i32
      %c2_i32_92 = arith.constant 2 : i32
      %118 = arith.muli %117, %c2_i32_92 : i32
      %119 = arith.index_cast %118 : i32 to index
      %120 = memref.load %arg1[%119] : memref<64xi32, #tpu.memory_space<smem>>
      %121 = arith.index_cast %120 : i32 to index
      %c0_93 = arith.constant 0 : index
      %122 = vector.load %arg13[%121, %c0_93] : memref<32x128xf32, #tpu.memory_space<vmem>>, vector<1x128xf32>
      %c2_i32_94 = arith.constant 2 : i32
      %123 = arith.muli %117, %c2_i32_94 : i32
      %c1_i32_95 = arith.constant 1 : i32
      %124 = arith.addi %123, %c1_i32_95 : i32
      %125 = arith.index_cast %124 : i32 to index
      %126 = memref.load %arg1[%125] : memref<64xi32, #tpu.memory_space<smem>>
      %127 = arith.index_cast %126 : i32 to index
      %c0_96 = arith.constant 0 : index
      %128 = vector.load %arg13[%127, %c0_96] : memref<32x128xf32, #tpu.memory_space<vmem>>, vector<1x128xf32>
      %129 = arith.addf %122, %128 : vector<1x128xf32>
      %130 = arith.maximumf %122, %128 : vector<1x128xf32>
      %131 = arith.mulf %129, %130 : vector<1x128xf32>
      %c5_i32 = arith.constant 5 : i32
      %132 = arith.addi %56, %c5_i32 : i32
      %c2_i32_97 = arith.constant 2 : i32
      %133 = arith.muli %132, %c2_i32_97 : i32
      %134 = arith.index_cast %133 : i32 to index
      %135 = memref.load %arg1[%134] : memref<64xi32, #tpu.memory_space<smem>>
      %136 = arith.index_cast %135 : i32 to index
      %c0_98 = arith.constant 0 : index
      %137 = vector.load %arg13[%136, %c0_98] : memref<32x128xf32, #tpu.memory_space<vmem>>, vector<1x128xf32>
      %c2_i32_99 = arith.constant 2 : i32
      %138 = arith.muli %132, %c2_i32_99 : i32
      %c1_i32_100 = arith.constant 1 : i32
      %139 = arith.addi %138, %c1_i32_100 : i32
      %140 = arith.index_cast %139 : i32 to index
      %141 = memref.load %arg1[%140] : memref<64xi32, #tpu.memory_space<smem>>
      %142 = arith.index_cast %141 : i32 to index
      %c0_101 = arith.constant 0 : index
      %143 = vector.load %arg13[%142, %c0_101] : memref<32x128xf32, #tpu.memory_space<vmem>>, vector<1x128xf32>
      %144 = arith.addf %137, %143 : vector<1x128xf32>
      %145 = arith.maximumf %137, %143 : vector<1x128xf32>
      %146 = arith.mulf %144, %145 : vector<1x128xf32>
      %c6_i32 = arith.constant 6 : i32
      %147 = arith.addi %56, %c6_i32 : i32
      %c2_i32_102 = arith.constant 2 : i32
      %148 = arith.muli %147, %c2_i32_102 : i32
      %149 = arith.index_cast %148 : i32 to index
      %150 = memref.load %arg1[%149] : memref<64xi32, #tpu.memory_space<smem>>
      %151 = arith.index_cast %150 : i32 to index
      %c0_103 = arith.constant 0 : index
      %152 = vector.load %arg13[%151, %c0_103] : memref<32x128xf32, #tpu.memory_space<vmem>>, vector<1x128xf32>
      %c2_i32_104 = arith.constant 2 : i32
      %153 = arith.muli %147, %c2_i32_104 : i32
      %c1_i32_105 = arith.constant 1 : i32
      %154 = arith.addi %153, %c1_i32_105 : i32
      %155 = arith.index_cast %154 : i32 to index
      %156 = memref.load %arg1[%155] : memref<64xi32, #tpu.memory_space<smem>>
      %157 = arith.index_cast %156 : i32 to index
      %c0_106 = arith.constant 0 : index
      %158 = vector.load %arg13[%157, %c0_106] : memref<32x128xf32, #tpu.memory_space<vmem>>, vector<1x128xf32>
      %159 = arith.addf %152, %158 : vector<1x128xf32>
      %160 = arith.maximumf %152, %158 : vector<1x128xf32>
      %161 = arith.mulf %159, %160 : vector<1x128xf32>
      %c7_i32 = arith.constant 7 : i32
      %162 = arith.addi %56, %c7_i32 : i32
      %c2_i32_107 = arith.constant 2 : i32
      %163 = arith.muli %162, %c2_i32_107 : i32
      %164 = arith.index_cast %163 : i32 to index
      %165 = memref.load %arg1[%164] : memref<64xi32, #tpu.memory_space<smem>>
      %166 = arith.index_cast %165 : i32 to index
      %c0_108 = arith.constant 0 : index
      %167 = vector.load %arg13[%166, %c0_108] : memref<32x128xf32, #tpu.memory_space<vmem>>, vector<1x128xf32>
      %c2_i32_109 = arith.constant 2 : i32
      %168 = arith.muli %162, %c2_i32_109 : i32
      %c1_i32_110 = arith.constant 1 : i32
      %169 = arith.addi %168, %c1_i32_110 : i32
      %170 = arith.index_cast %169 : i32 to index
      %171 = memref.load %arg1[%170] : memref<64xi32, #tpu.memory_space<smem>>
      %172 = arith.index_cast %171 : i32 to index
      %c0_111 = arith.constant 0 : index
      %173 = vector.load %arg13[%172, %c0_111] : memref<32x128xf32, #tpu.memory_space<vmem>>, vector<1x128xf32>
      %174 = arith.addf %167, %173 : vector<1x128xf32>
      %175 = arith.maximumf %167, %173 : vector<1x128xf32>
      %176 = arith.mulf %174, %175 : vector<1x128xf32>
      %177 = tpu.concatenate %71, %86, %101, %116, %131, %146, %161, %176 in 0 : vector<1x128xf32>, vector<1x128xf32>, vector<1x128xf32>, vector<1x128xf32>, vector<1x128xf32>, vector<1x128xf32>, vector<1x128xf32>, vector<1x128xf32> -> vector<8x128xf32>
      %178 = arith.index_cast %56 : i32 to index
      %c0_112 = arith.constant 0 : index
      %179 = vector.load %arg15[%178, %c0_112] : memref<32x128xf32, #tpu.memory_space<vmem>>, vector<8x128xf32>
      tpu.vector_store %arg15[%178, %c0_112], %177 {strides = array<i32>} : memref<32x128xf32, #tpu.memory_space<vmem>>, vector<8x128xf32>,
    }
    %c4_i32_32 = arith.constant 4 : i32
    %c0_i32_33 = arith.constant 0 : i32
    %c4_i32_34 = arith.constant 4 : i32
    %26 = arith.addi %c0_i32_33, %c4_i32_34 : i32
    %c1_i32_35 = arith.constant 1 : i32
    scf.for %arg17 = %c0_i32_33 to %26 step %c1_i32_35  : i32 {
      %c8_i32 = arith.constant 8 : i32
      %55 = arith.muli %arg17, %c8_i32 : i32
      %56 = tpu.assume_multiple %55, 8 : i32
      %57 = arith.index_cast %56 : i32 to index
      %c0_69 = arith.constant 0 : index
      %58 = vector.load %arg13[%57, %c0_69] : memref<32x128xf32, #tpu.memory_space<vmem>>, vector<8x128xf32>
      %59 = vector.extract_strided_slice %58 {offsets = [1, 0], sizes = [1, 128], strides = [1, 1]} : vector<8x128xf32> to vector<1x128xf32>
      %60 = vector.extract_strided_slice %58 {offsets = [0, 0], sizes = [1, 128], strides = [1, 1]} : vector<8x128xf32> to vector<1x128xf32>
      %61 = vector.extract_strided_slice %58 {offsets = [3, 0], sizes = [1, 128], strides = [1, 1]} : vector<8x128xf32> to vector<1x128xf32>
      %62 = vector.extract_strided_slice %58 {offsets = [2, 0], sizes = [1, 128], strides = [1, 1]} : vector<8x128xf32> to vector<1x128xf32>
      %63 = vector.extract_strided_slice %58 {offsets = [5, 0], sizes = [1, 128], strides = [1, 1]} : vector<8x128xf32> to vector<1x128xf32>
      %64 = vector.extract_strided_slice %58 {offsets = [4, 0], sizes = [1, 128], strides = [1, 1]} : vector<8x128xf32> to vector<1x128xf32>
      %65 = vector.extract_strided_slice %58 {offsets = [7, 0], sizes = [1, 128], strides = [1, 1]} : vector<8x128xf32> to vector<1x128xf32>
      %66 = vector.extract_strided_slice %58 {offsets = [6, 0], sizes = [1, 128], strides = [1, 1]} : vector<8x128xf32> to vector<1x128xf32>
      %67 = tpu.concatenate %59, %60, %61, %62, %63, %64, %65, %66 in 0 : vector<1x128xf32>, vector<1x128xf32>, vector<1x128xf32>, vector<1x128xf32>, vector<1x128xf32>, vector<1x128xf32>, vector<1x128xf32>, vector<1x128xf32> -> vector<8x128xf32>
      %c0_i32_70 = arith.constant 0 : i32
      %68 = arith.addi %56, %c0_i32_70 : i32
      %69 = arith.index_cast %68 : i32 to index
      %70 = memref.load %arg2[%69] : memref<32xi32, #tpu.memory_space<smem>>
      %71 = arith.index_cast %70 : i32 to index
      %c0_71 = arith.constant 0 : index
      %72 = vector.load %arg15[%71, %c0_71] : memref<32x128xf32, #tpu.memory_space<vmem>>, vector<1x128xf32>
      %c1_i32_72 = arith.constant 1 : i32
      %73 = arith.addi %56, %c1_i32_72 : i32
      %74 = arith.index_cast %73 : i32 to index
      %75 = memref.load %arg2[%74] : memref<32xi32, #tpu.memory_space<smem>>
      %76 = arith.index_cast %75 : i32 to index
      %c0_73 = arith.constant 0 : index
      %77 = vector.load %arg15[%76, %c0_73] : memref<32x128xf32, #tpu.memory_space<vmem>>, vector<1x128xf32>
      %c2_i32 = arith.constant 2 : i32
      %78 = arith.addi %56, %c2_i32 : i32
      %79 = arith.index_cast %78 : i32 to index
      %80 = memref.load %arg2[%79] : memref<32xi32, #tpu.memory_space<smem>>
      %81 = arith.index_cast %80 : i32 to index
      %c0_74 = arith.constant 0 : index
      %82 = vector.load %arg15[%81, %c0_74] : memref<32x128xf32, #tpu.memory_space<vmem>>, vector<1x128xf32>
      %c3_i32 = arith.constant 3 : i32
      %83 = arith.addi %56, %c3_i32 : i32
      %84 = arith.index_cast %83 : i32 to index
      %85 = memref.load %arg2[%84] : memref<32xi32, #tpu.memory_space<smem>>
      %86 = arith.index_cast %85 : i32 to index
      %c0_75 = arith.constant 0 : index
      %87 = vector.load %arg15[%86, %c0_75] : memref<32x128xf32, #tpu.memory_space<vmem>>, vector<1x128xf32>
      %c4_i32_76 = arith.constant 4 : i32
      %88 = arith.addi %56, %c4_i32_76 : i32
      %89 = arith.index_cast %88 : i32 to index
      %90 = memref.load %arg2[%89] : memref<32xi32, #tpu.memory_space<smem>>
      %91 = arith.index_cast %90 : i32 to index
      %c0_77 = arith.constant 0 : index
      %92 = vector.load %arg15[%91, %c0_77] : memref<32x128xf32, #tpu.memory_space<vmem>>, vector<1x128xf32>
      %c5_i32 = arith.constant 5 : i32
      %93 = arith.addi %56, %c5_i32 : i32
      %94 = arith.index_cast %93 : i32 to index
      %95 = memref.load %arg2[%94] : memref<32xi32, #tpu.memory_space<smem>>
      %96 = arith.index_cast %95 : i32 to index
      %c0_78 = arith.constant 0 : index
      %97 = vector.load %arg15[%96, %c0_78] : memref<32x128xf32, #tpu.memory_space<vmem>>, vector<1x128xf32>
      %c6_i32 = arith.constant 6 : i32
      %98 = arith.addi %56, %c6_i32 : i32
      %99 = arith.index_cast %98 : i32 to index
      %100 = memref.load %arg2[%99] : memref<32xi32, #tpu.memory_space<smem>>
      %101 = arith.index_cast %100 : i32 to index
      %c0_79 = arith.constant 0 : index
      %102 = vector.load %arg15[%101, %c0_79] : memref<32x128xf32, #tpu.memory_space<vmem>>, vector<1x128xf32>
      %c7_i32 = arith.constant 7 : i32
      %103 = arith.addi %56, %c7_i32 : i32
      %104 = arith.index_cast %103 : i32 to index
      %105 = memref.load %arg2[%104] : memref<32xi32, #tpu.memory_space<smem>>
      %106 = arith.index_cast %105 : i32 to index
      %c0_80 = arith.constant 0 : index
      %107 = vector.load %arg15[%106, %c0_80] : memref<32x128xf32, #tpu.memory_space<vmem>>, vector<1x128xf32>
      %108 = tpu.concatenate %72, %77, %82, %87, %92, %97, %102, %107 in 0 : vector<1x128xf32>, vector<1x128xf32>, vector<1x128xf32>, vector<1x128xf32>, vector<1x128xf32>, vector<1x128xf32>, vector<1x128xf32>, vector<1x128xf32> -> vector<8x128xf32>
      %109 = arith.subf %108, %67 : vector<8x128xf32>
      %110 = arith.truncf %109 : vector<8x128xf32> to vector<8x128xbf16>
      %111 = arith.index_cast %56 : i32 to index
      %c0_81 = arith.constant 0 : index
      %112 = vector.load %arg16[%111, %c0_81] : memref<32x128xbf16, #tpu.memory_space<vmem>>, vector<8x128xbf16>
      tpu.vector_store %arg16[%111, %c0_81], %110 {strides = array<i32>} : memref<32x128xbf16, #tpu.memory_space<vmem>>, vector<8x128xbf16>,
    }
    %c4_i32_36 = arith.constant 4 : i32
    %c0_37 = arith.constant 0 : index
    %c0_38 = arith.constant 0 : index
    %27 = vector.load %arg16[%c0_37, %c0_38] : memref<32x128xbf16, #tpu.memory_space<vmem>>, vector<32x128xbf16>
    %c1 = arith.constant 1 : index
    %c0_39 = arith.constant 0 : index
    %c0_40 = arith.constant 0 : index
    %28 = vector.load %arg7[%c1, %c0_39, %c0_40] : memref<2x128x128xbf16, #tpu.memory_space<vmem>>, vector<1x128x128xbf16>
    %29 = vector.shape_cast %28 : vector<1x128x128xbf16> to vector<128x128xbf16>
    %cst_41 = arith.constant dense<0.000000e+00> : vector<32x128xf32>
    %30 = tpu.matmul %27, %29, %cst_41 {dimension_numbers = #tpu.dot_dimension_numbers<[1], [0], [0], [1], [0, 0, 1, 1], [], []>} : vector<32x128xbf16>, vector<128x128xbf16>, vector<32x128xf32> -> vector<32x128xf32>
    %c1_42 = arith.constant 1 : index
    %c0_43 = arith.constant 0 : index
    %c0_44 = arith.constant 0 : index
    %31 = vector.load %arg8[%c1_42, %c0_43, %c0_44] : memref<2x1x128xf32, #tpu.memory_space<vmem>>, vector<1x1x128xf32>
    %32 = vector.shape_cast %31 : vector<1x1x128xf32> to vector<1x128xf32>
    %33 = vector.broadcast %32 : vector<1x128xf32> to vector<32x128xf32>
    %34 = arith.addf %30, %33 : vector<32x128xf32>
    %c0_45 = arith.constant 0 : index
    %c0_46 = arith.constant 0 : index
    %35 = vector.load %arg14[%c0_45, %c0_46] : memref<32x128xf32, #tpu.memory_space<vmem>>, vector<32x128xf32>
    %36 = arith.addf %35, %34 : vector<32x128xf32>
    %cst_47 = arith.constant 0.000000e+00 : f32
    %37 = vector.broadcast %cst_47 : f32 to vector<32x128xf32>
    %38 = arith.maximumf %36, %37 : vector<32x128xf32>
    %c0_48 = arith.constant 0 : index
    %c0_49 = arith.constant 0 : index
    %39 = vector.load %arg13[%c0_48, %c0_49] : memref<32x128xf32, #tpu.memory_space<vmem>>, vector<32x128xf32>
    tpu.vector_store %arg13[%c0_48, %c0_49], %38 {strides = array<i32>} : memref<32x128xf32, #tpu.memory_space<vmem>>, vector<32x128xf32>,
    %c0_i32_50 = arith.constant 0 : i32
    %c4_i32_51 = arith.constant 4 : i32
    %40 = arith.addi %c0_i32_50, %c4_i32_51 : i32
    %c1_i32_52 = arith.constant 1 : i32
    scf.for %arg17 = %c0_i32_50 to %40 step %c1_i32_52  : i32 {
      %c8_i32 = arith.constant 8 : i32
      %55 = arith.muli %arg17, %c8_i32 : i32
      %56 = tpu.assume_multiple %55, 8 : i32
      %c0_i32_69 = arith.constant 0 : i32
      %57 = arith.addi %56, %c0_i32_69 : i32
      %c2_i32 = arith.constant 2 : i32
      %58 = arith.muli %57, %c2_i32 : i32
      %59 = arith.index_cast %58 : i32 to index
      %60 = memref.load %arg1[%59] : memref<64xi32, #tpu.memory_space<smem>>
      %61 = arith.index_cast %60 : i32 to index
      %c0_70 = arith.constant 0 : index
      %62 = vector.load %arg13[%61, %c0_70] : memref<32x128xf32, #tpu.memory_space<vmem>>, vector<1x128xf32>
      %c2_i32_71 = arith.constant 2 : i32
      %63 = arith.muli %57, %c2_i32_71 : i32
      %c1_i32_72 = arith.constant 1 : i32
      %64 = arith.addi %63, %c1_i32_72 : i32
      %65 = arith.index_cast %64 : i32 to index
      %66 = memref.load %arg1[%65] : memref<64xi32, #tpu.memory_space<smem>>
      %67 = arith.index_cast %66 : i32 to index
      %c0_73 = arith.constant 0 : index
      %68 = vector.load %arg13[%67, %c0_73] : memref<32x128xf32, #tpu.memory_space<vmem>>, vector<1x128xf32>
      %69 = arith.addf %62, %68 : vector<1x128xf32>
      %70 = arith.maximumf %62, %68 : vector<1x128xf32>
      %71 = arith.mulf %69, %70 : vector<1x128xf32>
      %c1_i32_74 = arith.constant 1 : i32
      %72 = arith.addi %56, %c1_i32_74 : i32
      %c2_i32_75 = arith.constant 2 : i32
      %73 = arith.muli %72, %c2_i32_75 : i32
      %74 = arith.index_cast %73 : i32 to index
      %75 = memref.load %arg1[%74] : memref<64xi32, #tpu.memory_space<smem>>
      %76 = arith.index_cast %75 : i32 to index
      %c0_76 = arith.constant 0 : index
      %77 = vector.load %arg13[%76, %c0_76] : memref<32x128xf32, #tpu.memory_space<vmem>>, vector<1x128xf32>
      %c2_i32_77 = arith.constant 2 : i32
      %78 = arith.muli %72, %c2_i32_77 : i32
      %c1_i32_78 = arith.constant 1 : i32
      %79 = arith.addi %78, %c1_i32_78 : i32
      %80 = arith.index_cast %79 : i32 to index
      %81 = memref.load %arg1[%80] : memref<64xi32, #tpu.memory_space<smem>>
      %82 = arith.index_cast %81 : i32 to index
      %c0_79 = arith.constant 0 : index
      %83 = vector.load %arg13[%82, %c0_79] : memref<32x128xf32, #tpu.memory_space<vmem>>, vector<1x128xf32>
      %84 = arith.addf %77, %83 : vector<1x128xf32>
      %85 = arith.maximumf %77, %83 : vector<1x128xf32>
      %86 = arith.mulf %84, %85 : vector<1x128xf32>
      %c2_i32_80 = arith.constant 2 : i32
      %87 = arith.addi %56, %c2_i32_80 : i32
      %c2_i32_81 = arith.constant 2 : i32
      %88 = arith.muli %87, %c2_i32_81 : i32
      %89 = arith.index_cast %88 : i32 to index
      %90 = memref.load %arg1[%89] : memref<64xi32, #tpu.memory_space<smem>>
      %91 = arith.index_cast %90 : i32 to index
      %c0_82 = arith.constant 0 : index
      %92 = vector.load %arg13[%91, %c0_82] : memref<32x128xf32, #tpu.memory_space<vmem>>, vector<1x128xf32>
      %c2_i32_83 = arith.constant 2 : i32
      %93 = arith.muli %87, %c2_i32_83 : i32
      %c1_i32_84 = arith.constant 1 : i32
      %94 = arith.addi %93, %c1_i32_84 : i32
      %95 = arith.index_cast %94 : i32 to index
      %96 = memref.load %arg1[%95] : memref<64xi32, #tpu.memory_space<smem>>
      %97 = arith.index_cast %96 : i32 to index
      %c0_85 = arith.constant 0 : index
      %98 = vector.load %arg13[%97, %c0_85] : memref<32x128xf32, #tpu.memory_space<vmem>>, vector<1x128xf32>
      %99 = arith.addf %92, %98 : vector<1x128xf32>
      %100 = arith.maximumf %92, %98 : vector<1x128xf32>
      %101 = arith.mulf %99, %100 : vector<1x128xf32>
      %c3_i32 = arith.constant 3 : i32
      %102 = arith.addi %56, %c3_i32 : i32
      %c2_i32_86 = arith.constant 2 : i32
      %103 = arith.muli %102, %c2_i32_86 : i32
      %104 = arith.index_cast %103 : i32 to index
      %105 = memref.load %arg1[%104] : memref<64xi32, #tpu.memory_space<smem>>
      %106 = arith.index_cast %105 : i32 to index
      %c0_87 = arith.constant 0 : index
      %107 = vector.load %arg13[%106, %c0_87] : memref<32x128xf32, #tpu.memory_space<vmem>>, vector<1x128xf32>
      %c2_i32_88 = arith.constant 2 : i32
      %108 = arith.muli %102, %c2_i32_88 : i32
      %c1_i32_89 = arith.constant 1 : i32
      %109 = arith.addi %108, %c1_i32_89 : i32
      %110 = arith.index_cast %109 : i32 to index
      %111 = memref.load %arg1[%110] : memref<64xi32, #tpu.memory_space<smem>>
      %112 = arith.index_cast %111 : i32 to index
      %c0_90 = arith.constant 0 : index
      %113 = vector.load %arg13[%112, %c0_90] : memref<32x128xf32, #tpu.memory_space<vmem>>, vector<1x128xf32>
      %114 = arith.addf %107, %113 : vector<1x128xf32>
      %115 = arith.maximumf %107, %113 : vector<1x128xf32>
      %116 = arith.mulf %114, %115 : vector<1x128xf32>
      %c4_i32_91 = arith.constant 4 : i32
      %117 = arith.addi %56, %c4_i32_91 : i32
      %c2_i32_92 = arith.constant 2 : i32
      %118 = arith.muli %117, %c2_i32_92 : i32
      %119 = arith.index_cast %118 : i32 to index
      %120 = memref.load %arg1[%119] : memref<64xi32, #tpu.memory_space<smem>>
      %121 = arith.index_cast %120 : i32 to index
      %c0_93 = arith.constant 0 : index
      %122 = vector.load %arg13[%121, %c0_93] : memref<32x128xf32, #tpu.memory_space<vmem>>, vector<1x128xf32>
      %c2_i32_94 = arith.constant 2 : i32
      %123 = arith.muli %117, %c2_i32_94 : i32
      %c1_i32_95 = arith.constant 1 : i32
      %124 = arith.addi %123, %c1_i32_95 : i32
      %125 = arith.index_cast %124 : i32 to index
      %126 = memref.load %arg1[%125] : memref<64xi32, #tpu.memory_space<smem>>
      %127 = arith.index_cast %126 : i32 to index
      %c0_96 = arith.constant 0 : index
      %128 = vector.load %arg13[%127, %c0_96] : memref<32x128xf32, #tpu.memory_space<vmem>>, vector<1x128xf32>
      %129 = arith.addf %122, %128 : vector<1x128xf32>
      %130 = arith.maximumf %122, %128 : vector<1x128xf32>
      %131 = arith.mulf %129, %130 : vector<1x128xf32>
      %c5_i32 = arith.constant 5 : i32
      %132 = arith.addi %56, %c5_i32 : i32
      %c2_i32_97 = arith.constant 2 : i32
      %133 = arith.muli %132, %c2_i32_97 : i32
      %134 = arith.index_cast %133 : i32 to index
      %135 = memref.load %arg1[%134] : memref<64xi32, #tpu.memory_space<smem>>
      %136 = arith.index_cast %135 : i32 to index
      %c0_98 = arith.constant 0 : index
      %137 = vector.load %arg13[%136, %c0_98] : memref<32x128xf32, #tpu.memory_space<vmem>>, vector<1x128xf32>
      %c2_i32_99 = arith.constant 2 : i32
      %138 = arith.muli %132, %c2_i32_99 : i32
      %c1_i32_100 = arith.constant 1 : i32
      %139 = arith.addi %138, %c1_i32_100 : i32
      %140 = arith.index_cast %139 : i32 to index
      %141 = memref.load %arg1[%140] : memref<64xi32, #tpu.memory_space<smem>>
      %142 = arith.index_cast %141 : i32 to index
      %c0_101 = arith.constant 0 : index
      %143 = vector.load %arg13[%142, %c0_101] : memref<32x128xf32, #tpu.memory_space<vmem>>, vector<1x128xf32>
      %144 = arith.addf %137, %143 : vector<1x128xf32>
      %145 = arith.maximumf %137, %143 : vector<1x128xf32>
      %146 = arith.mulf %144, %145 : vector<1x128xf32>
      %c6_i32 = arith.constant 6 : i32
      %147 = arith.addi %56, %c6_i32 : i32
      %c2_i32_102 = arith.constant 2 : i32
      %148 = arith.muli %147, %c2_i32_102 : i32
      %149 = arith.index_cast %148 : i32 to index
      %150 = memref.load %arg1[%149] : memref<64xi32, #tpu.memory_space<smem>>
      %151 = arith.index_cast %150 : i32 to index
      %c0_103 = arith.constant 0 : index
      %152 = vector.load %arg13[%151, %c0_103] : memref<32x128xf32, #tpu.memory_space<vmem>>, vector<1x128xf32>
      %c2_i32_104 = arith.constant 2 : i32
      %153 = arith.muli %147, %c2_i32_104 : i32
      %c1_i32_105 = arith.constant 1 : i32
      %154 = arith.addi %153, %c1_i32_105 : i32
      %155 = arith.index_cast %154 : i32 to index
      %156 = memref.load %arg1[%155] : memref<64xi32, #tpu.memory_space<smem>>
      %157 = arith.index_cast %156 : i32 to index
      %c0_106 = arith.constant 0 : index
      %158 = vector.load %arg13[%157, %c0_106] : memref<32x128xf32, #tpu.memory_space<vmem>>, vector<1x128xf32>
      %159 = arith.addf %152, %158 : vector<1x128xf32>
      %160 = arith.maximumf %152, %158 : vector<1x128xf32>
      %161 = arith.mulf %159, %160 : vector<1x128xf32>
      %c7_i32 = arith.constant 7 : i32
      %162 = arith.addi %56, %c7_i32 : i32
      %c2_i32_107 = arith.constant 2 : i32
      %163 = arith.muli %162, %c2_i32_107 : i32
      %164 = arith.index_cast %163 : i32 to index
      %165 = memref.load %arg1[%164] : memref<64xi32, #tpu.memory_space<smem>>
      %166 = arith.index_cast %165 : i32 to index
      %c0_108 = arith.constant 0 : index
      %167 = vector.load %arg13[%166, %c0_108] : memref<32x128xf32, #tpu.memory_space<vmem>>, vector<1x128xf32>
      %c2_i32_109 = arith.constant 2 : i32
      %168 = arith.muli %162, %c2_i32_109 : i32
      %c1_i32_110 = arith.constant 1 : i32
      %169 = arith.addi %168, %c1_i32_110 : i32
      %170 = arith.index_cast %169 : i32 to index
      %171 = memref.load %arg1[%170] : memref<64xi32, #tpu.memory_space<smem>>
      %172 = arith.index_cast %171 : i32 to index
      %c0_111 = arith.constant 0 : index
      %173 = vector.load %arg13[%172, %c0_111] : memref<32x128xf32, #tpu.memory_space<vmem>>, vector<1x128xf32>
      %174 = arith.addf %167, %173 : vector<1x128xf32>
      %175 = arith.maximumf %167, %173 : vector<1x128xf32>
      %176 = arith.mulf %174, %175 : vector<1x128xf32>
      %177 = tpu.concatenate %71, %86, %101, %116, %131, %146, %161, %176 in 0 : vector<1x128xf32>, vector<1x128xf32>, vector<1x128xf32>, vector<1x128xf32>, vector<1x128xf32>, vector<1x128xf32>, vector<1x128xf32>, vector<1x128xf32> -> vector<8x128xf32>
      %178 = arith.index_cast %56 : i32 to index
      %c0_112 = arith.constant 0 : index
      %179 = vector.load %arg15[%178, %c0_112] : memref<32x128xf32, #tpu.memory_space<vmem>>, vector<8x128xf32>
      tpu.vector_store %arg15[%178, %c0_112], %177 {strides = array<i32>} : memref<32x128xf32, #tpu.memory_space<vmem>>, vector<8x128xf32>,
    }
    %c4_i32_53 = arith.constant 4 : i32
    %c0_54 = arith.constant 0 : index
    %c0_55 = arith.constant 0 : index
    %41 = vector.load %arg4[%c0_54, %c0_55] : memref<32x24xbf16, #tpu.memory_space<vmem>>, vector<32x24xbf16>
    %c0_56 = arith.constant 0 : index
    %c0_57 = arith.constant 0 : index
    %42 = vector.load %arg9[%c0_56, %c0_57] : memref<24x128xbf16, #tpu.memory_space<vmem>>, vector<24x128xbf16>
    %cst_58 = arith.constant dense<0.000000e+00> : vector<32x128xf32>
    %43 = tpu.matmul %41, %42, %cst_58 {dimension_numbers = #tpu.dot_dimension_numbers<[1], [0], [0], [1], [0, 0, 1, 1], [], []>} : vector<32x24xbf16>, vector<24x128xbf16>, vector<32x128xf32> -> vector<32x128xf32>
    %c0_59 = arith.constant 0 : index
    %c0_60 = arith.constant 0 : index
    %44 = vector.load %arg15[%c0_59, %c0_60] : memref<32x128xf32, #tpu.memory_space<vmem>>, vector<32x128xf32>
    %45 = arith.truncf %44 : vector<32x128xf32> to vector<32x128xbf16>
    %c0_61 = arith.constant 0 : index
    %c0_62 = arith.constant 0 : index
    %46 = vector.load %arg10[%c0_61, %c0_62] : memref<128x128xbf16, #tpu.memory_space<vmem>>, vector<128x128xbf16>
    %cst_63 = arith.constant dense<0.000000e+00> : vector<32x128xf32>
    %47 = tpu.matmul %45, %46, %cst_63 {dimension_numbers = #tpu.dot_dimension_numbers<[1], [0], [0], [1], [0, 0, 1, 1], [], []>} : vector<32x128xbf16>, vector<128x128xbf16>, vector<32x128xf32> -> vector<32x128xf32>
    %48 = arith.addf %43, %47 : vector<32x128xf32>
    %c0_64 = arith.constant 0 : index
    %c0_65 = arith.constant 0 : index
    %49 = vector.load %arg11[%c0_64, %c0_65] : memref<1x128xf32, #tpu.memory_space<vmem>>, vector<1x128xf32>
    %50 = vector.broadcast %49 : vector<1x128xf32> to vector<32x128xf32>
    %51 = arith.addf %48, %50 : vector<32x128xf32>
    %cst_66 = arith.constant 0.000000e+00 : f32
    %52 = vector.broadcast %cst_66 : f32 to vector<32x128xf32>
    %53 = arith.maximumf %51, %52 : vector<32x128xf32>
    %c0_67 = arith.constant 0 : index
    %c0_68 = arith.constant 0 : index
    %54 = vector.load %arg12[%c0_67, %c0_68] : memref<32x128xf32, #tpu.memory_space<vmem>>, vector<32x128xf32>
    tpu.vector_store %arg12[%c0_67, %c0_68], %53 {strides = array<i32>} : memref<32x128xf32, #tpu.memory_space<vmem>>, vector<32x128xf32>,
    return
  }
  func.func @transform_0(%arg0: i32, %arg1: memref<64xi32, #tpu.memory_space<smem>>, %arg2: memref<32xi32, #tpu.memory_space<smem>>) -> (i32, i32) {
    %c0_i32 = arith.constant 0 : i32
    %c0_i32_0 = arith.constant 0 : i32
    %c0_i32_1 = arith.constant 0 : i32
    return %c0_i32, %c0_i32_0 : i32, i32
  }
  func.func @transform_1(%arg0: i32, %arg1: memref<64xi32, #tpu.memory_space<smem>>, %arg2: memref<32xi32, #tpu.memory_space<smem>>) -> (i32, i32) {
    %c0_i32 = arith.constant 0 : i32
    %c0_i32_0 = arith.constant 0 : i32
    %c0_i32_1 = arith.constant 0 : i32
    return %c0_i32, %c0_i32_0 : i32, i32
  }
  func.func @transform_2(%arg0: i32, %arg1: memref<64xi32, #tpu.memory_space<smem>>, %arg2: memref<32xi32, #tpu.memory_space<smem>>) -> (i32, i32) {
    %c0_i32 = arith.constant 0 : i32
    %c0_i32_0 = arith.constant 0 : i32
    %c0_i32_1 = arith.constant 0 : i32
    return %c0_i32, %c0_i32_0 : i32, i32
  }
  func.func @transform_3(%arg0: i32, %arg1: memref<64xi32, #tpu.memory_space<smem>>, %arg2: memref<32xi32, #tpu.memory_space<smem>>) -> (i32, i32) {
    %c0_i32 = arith.constant 0 : i32
    %c0_i32_0 = arith.constant 0 : i32
    %c0_i32_1 = arith.constant 0 : i32
    return %c0_i32, %c0_i32_0 : i32, i32
  }
  func.func @transform_4(%arg0: i32, %arg1: memref<64xi32, #tpu.memory_space<smem>>, %arg2: memref<32xi32, #tpu.memory_space<smem>>) -> (i32, i32, i32) {
    %c0_i32 = arith.constant 0 : i32
    %c0_i32_0 = arith.constant 0 : i32
    %c0_i32_1 = arith.constant 0 : i32
    %c0_i32_2 = arith.constant 0 : i32
    return %c0_i32, %c0_i32_0, %c0_i32_1 : i32, i32, i32
  }
  func.func @transform_5(%arg0: i32, %arg1: memref<64xi32, #tpu.memory_space<smem>>, %arg2: memref<32xi32, #tpu.memory_space<smem>>) -> (i32, i32, i32) {
    %c0_i32 = arith.constant 0 : i32
    %c0_i32_0 = arith.constant 0 : i32
    %c0_i32_1 = arith.constant 0 : i32
    %c0_i32_2 = arith.constant 0 : i32
    return %c0_i32, %c0_i32_0, %c0_i32_1 : i32, i32, i32
  }
  func.func @transform_6(%arg0: i32, %arg1: memref<64xi32, #tpu.memory_space<smem>>, %arg2: memref<32xi32, #tpu.memory_space<smem>>) -> (i32, i32) {
    %c0_i32 = arith.constant 0 : i32
    %c0_i32_0 = arith.constant 0 : i32
    %c0_i32_1 = arith.constant 0 : i32
    return %c0_i32, %c0_i32_0 : i32, i32
  }
  func.func @transform_7(%arg0: i32, %arg1: memref<64xi32, #tpu.memory_space<smem>>, %arg2: memref<32xi32, #tpu.memory_space<smem>>) -> (i32, i32) {
    %c0_i32 = arith.constant 0 : i32
    %c0_i32_0 = arith.constant 0 : i32
    %c0_i32_1 = arith.constant 0 : i32
    return %c0_i32, %c0_i32_0 : i32, i32
  }
  func.func @transform_8(%arg0: i32, %arg1: memref<64xi32, #tpu.memory_space<smem>>, %arg2: memref<32xi32, #tpu.memory_space<smem>>) -> (i32, i32) {
    %c0_i32 = arith.constant 0 : i32
    %c0_i32_0 = arith.constant 0 : i32
    %c0_i32_1 = arith.constant 0 : i32
    return %c0_i32, %c0_i32_0 : i32, i32
  }
  func.func @transform_9(%arg0: i32, %arg1: memref<64xi32, #tpu.memory_space<smem>>, %arg2: memref<32xi32, #tpu.memory_space<smem>>) -> (i32, i32) {
    %c0_i32 = arith.constant 0 : i32
    %c0_i32_0 = arith.constant 0 : i32
    %c0_i32_1 = arith.constant 0 : i32
    return %c0_i32, %c0_i32_0 : i32, i32
  }
}

</mosaic_0001>

<bundles_post_ra>
// kernel: tpu_custom_call.1
= control target key start
LH: loop header
LB: loop body
LE: loop exit
PB: predicated region body
PF: predicated region fallthrough
CT: control target
= control target key end

     0   :  { %s2236_s0 = inlined_call_operand.vmem [shape: s32[64], index: 0, kind: input, shape index: {}]   ;;  %s2237_s2 = inlined_call_operand.hbm [shape: bf16[32,40], index: 2, kind: input, shape index: {}]   ;;  %s2238_s3 = inlined_call_operand.vmem [shape: bf16[32,24], index: 3, kind: input, shape index: {}]   ;;  %s2239_s4 = inlined_call_operand.vmem [shape: bf16[40,128], index: 4, kind: input, shape index: {}]   ;;  %s2240_s5 = inlined_call_operand.vmem [shape: f32[1,128], index: 5, kind: input, shape index: {}]   ;;  %s2241_s6 = inlined_call_operand.hbm [shape: bf16[2,128,128], index: 6, kind: input, shape index: {}]   ;;  %s2242_s7 = inlined_call_operand.vmem [shape: f32[2,1,128], index: 7, kind: input, shape index: {}]   ;;  %s2243_s8 = inlined_call_operand.vmem [shape: bf16[24,128], index: 8, kind: input, shape index: {}]   ;;  %s2244_s9 = inlined_call_operand.hbm [shape: bf16[128,128], index: 9, kind: input, shape index: {}]   ;;  %s2245_s10 = inlined_call_operand.vmem [shape: f32[1,128], index: 10, kind: input, shape index: {}]   ;;  %s2246_s11 = inlined_call_operand.hbm [shape: f32[32,128], index: 11, kind: output, shape index: {}]   ;;  %s2247_s1 = inlined_call_operand.hbm [shape: s32[32], index: 1, kind: input, shape index: {}]  }
   0x1   :  { %s16_s19 = sshll.u32 %s2236_s0, 4  ;;  %s17_s19 = int_to_ptr.vmem [resolvable:$true] %s16_s19 }
   0x2   :  { %s1797_s20 = scalar_lea.vmem %s17_s19, 16  ;;  %p1802_p1 = scmp.lt.s32.totalorder %s17_s19, %s17_s19 }
   0x3   :  { %p1798_p0 = scmp.ne.s32.totalorder %s17_s19, %s1797_s20  ;;  %p1803_p2 = scmp.lt.s32.totalorder %s1797_s20, %s1797_s20 }
   0x5   :  { %p1804_p3 = por %p1803_p2, %p1802_p1 }
   0x7   :  { %p1805_p4 = pnand %p1804_p3, %p1798_p0 }
   0x9   :  { %1808 = shalt.err (!%p1805_p4)  }
   0xa   :  { %s1945_s21 = smov [#allocation7]   ;;  %s1946_s22 = smov [#allocation8]  }
   0xb   :  { %19 = dma.vmem_to_smem %s17_s19, 16, %s1945_s21, [#allocation6] }
   0xc   :  { %21 = dma.hbm_to_smem %s2247_s1, 16, %s1946_s22, [#allocation6] }
   0xd   :  { %1917 = dma.done.wait [#allocation6], 32 }
   0xe   :  { %1918 = vsyncadd [#allocation6], 4294967264 }
   0xf   :  { %23 = sfence }
  0x10   :  { %24 = vsyncpa [#allocation10], 0 }
  0x11   :  { %25 = vsyncpa [#allocation13], 0 }
  0x12   :  { %26 = vsyncpa [#allocation11], 0  ;;  %s1947_s0 = smov [#allocation12]   ;;  %s1948_s26 = smov [#allocation9]  }
  0x13   :  { %s50_s25 = sshll.u32 %s1947_s0, 4  ;;  %s32_s27 = sshll.u32 %s1948_s26, 4  ;;  %s51_s25 = int_to_ptr.vmem [resolvable:$true] %s50_s25  ;;  %s33_s27 = int_to_ptr.vmem [resolvable:$true] %s32_s27 }
  0x14   :  { %s1825_s28 = scalar_lea.vmem %s51_s25, 2048  ;;  %p1830_p6 = scmp.lt.s32.totalorder %s51_s25, %s51_s25 }
  0x15   :  { %p1826_p5 = scmp.ne.s32.totalorder %s51_s25, %s1825_s28  ;;  %p1831_p7 = scmp.lt.s32.totalorder %s1825_s28, %s1825_s28 }
  0x17   :  { %p1832_p8 = por %p1831_p7, %p1830_p6 }
  0x19   :  { %p1833_p9 = pnand %p1832_p8, %p1826_p5 }
  0x1b   :  { %1836 = shalt.err (!%p1833_p9)
}
  0x1c   :  { %s1949_s1 = smov 64   ;;  %s1950_s29 = smov 4  }
  0x1d   :  { %56 = dma.hbm_to_vmem [thread:$0]  %s2241_s6, 2048, %s51_s25, [#allocation13], %s1949_s1, %s1949_s1, %s1950_s29  }
  0x1e   :  { %s1845_s13 = scalar_lea.vmem %s33_s27, 256  ;;  %p1850_p11 = scmp.lt.s32.totalorder %s33_s27, %s33_s27 }
  0x1f   :  { %p1846_p10 = scmp.ne.s32.totalorder %s33_s27, %s1845_s13  ;;  %p1851_p12 = scmp.lt.s32.totalorder %s1845_s13, %s1845_s13 }
  0x21   :  { %p1852_p13 = por %p1851_p12, %p1850_p11 }
  0x23   :  { %p1853_p0 = pnand %p1852_p13, %p1846_p10 }
  0x25   :  { %1856 = shalt.err (!%p1853_p0)
}
  0x26   :  { %38 = dma.hbm_to_vmem [thread:$0]  %s2237_s2, 256, %s33_s27, [#allocation10], %s1949_s1, %s1949_s1, %s1950_s29  }
  0x27   :  { %s1951_s16 = smov [#allocation14]  }
  0x28   :  { %s66_s17 = sshll.u32 %s1951_s16, 4  ;;  %s67_s17 = int_to_ptr.vmem [resolvable:$true] %s66_s17 }
  0x29   :  { %s1865_s18 = scalar_lea.vmem %s67_s17, 1024  ;;  %p1870_p2 = scmp.lt.s32.totalorder %s67_s17, %s67_s17 }
  0x2a   :  { %p1866_p1 = scmp.ne.s32.totalorder %s67_s17, %s1865_s18  ;;  %p1871_p3 = scmp.lt.s32.totalorder %s1865_s18, %s1865_s18 }
  0x2c   :  { %p1872_p4 = por %p1871_p3, %p1870_p2 }
  0x2e   :  { %p1873_p5 = pnand %p1872_p4, %p1866_p1 }
  0x30   :  { %1876 = shalt.err (!%p1873_p5)
}
  0x31   :  { %72 = dma.hbm_to_vmem [thread:$0]  %s2244_s9, 1024, %s67_s17, [#allocation13], %s1949_s1, %s1949_s1, %s1950_s29  }
  0x32   :  { %1919 = dma.done.wait [#allocation10], 256  }
  0x33   :  { %1920 = vsyncadd [#allocation10], 4294967040 }
  0x34   :  { %1921 = dma.done.wait [#allocation13], 3072  }
  0x35   :  { %1922 = vsyncadd [#allocation13], 4294964224  ;;  %vm133_vm0 = vcmask 1043456   ;;  %v1760_v0 = vld [vmem:[%s2239_s4 + $0x10] ss:$0 sps:$4 sm:$0xff]   ;;  %v1761_v1 = vld [vmem:[%s2239_s4 + $0x8] sm:$0xff]  }
  0x36   :  { %1708 = vmatprep.subr.msk.bf16.mxu0 %vm133_vm0, %v1760_v0  ;;  %v135_v2 = vsel %vm133_vm0, %v1760_v0, 0  ;;  %vm126_vm1 = vcmask 326656   ;;  %v1763_v3 = vld [vmem:[#allocation9] sm:$0xff]   ;;  %v1762_v4 = vld [vmem:[%s2239_s4] sm:$0xff]   ;;  %v1764_v5 = vld [vmem:[#allocation9 + $0x8] sm:$0xff]   ;;  %s2044_s4 = smov 0  }
  0x37   :  { %1631 = vmatpush3.bf16.msra.mxu0 %v135_v2  ;;  %1636 = vmatprep.mubr.msk.bf16.mxu0 %vm126_vm1, %v1763_v3  ;;  %v1448_v6 = vld [vmem:[%s2240_s5] ss:$0 sm:$0xff] }
  0x38   :  { %1632 = vmatprep.subr.bf16.mxu0 %v1761_v1 }
  0x3b   :  { %1633 = vmatpush3.bf16.msra.mxu0 %v1761_v1 }
  0x3c   :  { %1634 = vmatprep.subr.bf16.mxu0 %v1762_v4 }
  0x3f   :  { %1635 = vmatpush3.bf16.msra.mxu0 %v1762_v4 }
  0x42   :  { %1637 = vmatmul.mubr.msk.bf16.vlgmr.msra.gmra.mxu0 %vm126_vm1, %v1764_v5 }
 0x102   :  { %v1638_v7 = vpop.f32.mrf.mxu0 }
 0x103   :  { %v180_v8 = vadd.f32 %v1638_v7, %v1448_v6 }
 0x104   :  { %v171_v9 = vpop.f32.mrf.mxu0 }
 0x105   :  { %188 = vst [vmem:[#allocation3 + $0x18] sm:$0xff] %v180_v8  ;;  %v192_v10 = vmax.f32 %v180_v8, 0.0  ;;  %v172_v11 = vadd.f32 %v1448_v6, %v171_v9 }
 0x106   :  { %v1639_v12 = vpop.f32.mrf.mxu0 }
 0x107   :  { %196 = vst [vmem:[#allocation2 + $0x10] sm:$0xff] %v192_v10  ;;  %186 = vst [vmem:[#allocation3 + $0x10] sm:$0xff] %v172_v11  ;;  %v190_v13 = vmax.f32 %v172_v11, 0.0  ;;  %v183_v14 = vadd.f32 %v1639_v12, %v1448_v6 }
 0x108   :  { %v174_v15 = vpop.f32.mrf.mxu0 }
 0x109   :  { %194 = vst [vmem:[#allocation2] sm:$0xff] %v190_v13  ;;  %189 = vst [vmem:[#allocation3 + $0x8] sm:$0xff] %v183_v14  ;;  %v193_v16 = vmax.f32 %v183_v14, 0.0  ;;  %v175_v17 = vadd.f32 %v1448_v6, %v174_v15 }
 0x10b   :  { %197 = vst [vmem:[#allocation2 + $0x18] sm:$0xff] %v193_v16  ;;  %187 = vst [vmem:[#allocation3] sm:$0xff] %v175_v17  ;;  %v191_v18 = vmax.f32 %v175_v17, 0.0 }
 0x10d   :  { %195 = vst [vmem:[#allocation2 + $0x8] sm:$0xff] %v191_v18 }
 0x10e LB: > { %s2050_s5 = sshll.u32 %s1927_s4, 4  ;;  %vm321_vm2 = vcmask 1040384   ;;  %vm323_vm3 = vcmask 1041408   ;;  %vm325_vm4 = vcmask 1042432   ;;  %vm328_vm5 = vcmask 1044480   ;;  %s1927_s4 = sphi %s2044_s4, %s203_s4  }
 0x10f   : > { %s206_s25 = sld [smem:[#allocation7 + %s2050_s5]]  ;;  %s209_s26 = sadd.s32 1, %s2050_s5  ;;  %vm330_vm6 = vcmask 1045504   ;;  %vm332_vm7 = vcmask 1046528  }
 0x110   : > { %s210_s27 = sld [smem:[#allocation7 + %s209_s26]]  ;;  %s1527_s28 = sadd.s32 2, %s2050_s5 }
 0x111   : > { %s218_s1 = sld [smem:[#allocation7 + %s1527_s28]]  ;;  %s221_s29 = sadd.s32 1, %s1527_s28 }
 0x112   : > { %s222_s30 = sld [smem:[#allocation7 + %s221_s29]]  ;;  %s1529_s12 = sadd.s32 4, %s2050_s5 }
 0x113   : > { %s230_s13 = sld [smem:[#allocation7 + %s1529_s12]]  ;;  %s233_s14 = sadd.s32 1, %s1529_s12 }
 0x114   : > { %s234_s15 = sld [smem:[#allocation7 + %s233_s14]]  ;;  %s1531_s16 = sadd.s32 6, %s2050_s5 }
 0x115   : > { %s242_s17 = sld [smem:[#allocation7 + %s1531_s16]]  ;;  %s207_s18 = scalar_lea.vmem [#allocation2], %s206_s25 }
 0x116   : > { %v208_v19 = vld [vmem:[%s207_s18] sm:$0x1]  ;;  %s245_s6 = sadd.s32 1, %s1531_s16  ;;  %s211_s19 = scalar_lea.vmem [#allocation2], %s210_s27 }
 0x117   : > { %v212_v20 = vld [vmem:[%s211_s19] sm:$0x1]  ;;  %s246_s2 = sld [smem:[#allocation7 + %s245_s6]]  ;;  %s219_s20 = scalar_lea.vmem [#allocation2], %s218_s1 }
 0x118   : > { %v220_v21 = vld [vmem:[%s219_s20] sm:$0x1]  ;;  %s1533_s21 = sadd.s32 8, %s2050_s5  ;;  %v213_v22 = vadd.f32 %v212_v20, %v208_v19  ;;  %v214_v23 = vmax.f32 %v208_v19, %v212_v20  ;;  %s223_s22 = scalar_lea.vmem [#allocation2], %s222_s30 }
 0x119   : > { %v224_v24 = vld [vmem:[%s223_s22] sm:$0x1]  ;;  %s2058_s9 = sld [smem:[#allocation7 + %s1533_s21]]  ;;  %s231_s23 = scalar_lea.vmem [#allocation2], %s230_s13 }
 0x11a   : > { %v225_v25 = vadd.f32 %v224_v24, %v220_v21  ;;  %v226_v26 = vmax.f32 %v220_v21, %v224_v24  ;;  %v232_v27 = vld [vmem:[%s231_s23] sm:$0x1]  ;;  %s257_s24 = sadd.s32 1, %s1533_s21  ;;  %s235_s0 = scalar_lea.vmem [#allocation2], %s234_s15  ;;  %v215_v33 = vmul.f32 %v214_v23, %v213_v22 }
 0x11b   : > { %v236_v28 = vld [vmem:[%s235_s0] sm:$0x1]  ;;  %s2060_s25 = sld [smem:[#allocation7 + %s257_s24]]  ;;  %s243_s26 = scalar_lea.vmem [#allocation2], %s242_s17 }
 0x11c   : > { %v227_v29 = vmul.f32 %v226_v26, %v225_v25  ;;  %v237_v30 = vadd.f32 %v236_v28, %v232_v27  ;;  %v238_v31 = vmax.f32 %v232_v27, %v236_v28  ;;  %v244_v32 = vld [vmem:[%s243_s26] sm:$0x1]  ;;  %s1535_s27 = sadd.s32 10, %s2050_s5  ;;  %s1537_s28 = sadd.s32 12, %s2050_s5 }
 0x11d   : > { %s2064_s1 = sld [smem:[#allocation7 + %s1535_s27]]  ;;  %s247_s29 = scalar_lea.vmem [#allocation2], %s246_s2 }
 0x11e   : > { %v239_v34 = vmul.f32 %v238_v31, %v237_v30  ;;  %v248_v35 = vld [vmem:[%s247_s29] sm:$0x1]  ;;  %s269_s30 = sadd.s32 1, %s1535_s27  ;;  %s2066_s12 = sld [smem:[#allocation7 + %s1537_s28]]  ;;  %v301_v36 = vrot.slane %v227_v29, 7 }
 0x11f   : > { %v249_v37 = vadd.f32 %v248_v35, %v244_v32  ;;  %v250_v38 = vmax.f32 %v244_v32, %v248_v35  ;;  %s270_s13 = sld [smem:[#allocation7 + %s269_s30]]  ;;  %s255_s14 = scalar_lea.vmem [#allocation2], %s2058_s9 }
 0x120   : > { %v256_v39 = vld [vmem:[%s255_s14] sm:$0x1]  ;;  %s281_s15 = sadd.s32 1, %s1537_s28  ;;  %s1539_s16 = sadd.s32 14, %s2050_s5  ;;  %v304_v40 = vrot.slane %v239_v34, 6  ;;  %v322_v42 = vsel %vm321_vm2, %v215_v33, %v301_v36 }
 0x121   : > { %v251_v41 = vmul.f32 %v250_v38, %v249_v37  ;;  %s282_s17 = sld [smem:[#allocation7 + %s281_s15]]  ;;  %s259_s18 = scalar_lea.vmem [#allocation2], %s2060_s25 }
 0x122   : > { %v260_v43 = vld [vmem:[%s259_s18] sm:$0x1]  ;;  %s290_s6 = sld [smem:[#allocation7 + %s1539_s16]]  ;;  %s293_s19 = sadd.s32 1, %s1539_s16  ;;  %v324_v48 = vsel %vm323_vm3, %v322_v42, %v304_v40 }
 0x123   : > { %v261_v44 = vadd.f32 %v260_v43, %v256_v39  ;;  %v262_v45 = vmax.f32 %v256_v39, %v260_v43  ;;  %s294_s2 = sld [smem:[#allocation7 + %s293_s19]]  ;;  %v307_v46 = vrot.slane %v251_v41, 5  ;;  %s267_s20 = scalar_lea.vmem [#allocation2], %s2064_s1 }
 0x124   : > { %v268_v47 = vld [vmem:[%s267_s20] sm:$0x1]  ;;  %s279_s21 = scalar_lea.vmem [#allocation2], %s2066_s12  ;;  %s1456_s24 = sshll.u32 %s1927_s4, 3 }
 0x125   : > { %v263_v49 = vmul.f32 %v262_v45, %v261_v44  ;;  %s271_s5 = scalar_lea.vmem [#allocation2], %s270_s13  ;;  %v280_v51 = vld [vmem:[%s279_s21] sm:$0x1]  ;;  %v326_v55 = vsel %vm325_vm4, %v324_v48, %v307_v46  ;;  %s334_s0 = scalar_lea.vmem [#allocation4], %s1456_s24 }
 0x126   : > { %v272_v50 = vld [vmem:[%s271_s5] sm:$0x1]  ;;  %s203_s4 = sadd.s32 1, %s1927_s4  }
 0x127   : > { %v273_v52 = vadd.f32 %v272_v50, %v268_v47  ;;  %v274_v53 = vmax.f32 %v268_v47, %v272_v50  ;;  %v310_v54 = vrot.slane %v263_v49, 4  ;;  %s283_s22 = scalar_lea.vmem [#allocation2], %s282_s17  ;;  %p200_p6 = scmp.ge.s32.totalorder %s203_s4, 4  }
 0x128   : > { %v284_v56 = vld [vmem:[%s283_s22] sm:$0x1]  ;;  %s291_s9 = scalar_lea.vmem [#allocation2], %s290_s6  ;;  %s2084_s25 = smov (%p200_p6), 0  }
 0x129   : > { %v275_v57 = vmul.f32 %v274_v53, %v273_v52  ;;  %v285_v58 = vadd.f32 %v284_v56, %v280_v51  ;;  %v286_v59 = vmax.f32 %v280_v51, %v284_v56  ;;  %v292_v60 = vld [vmem:[%s291_s9] sm:$0x1]  ;;  %s295_s23 = scalar_lea.vmem [#allocation2], %s294_s2  ;;  %v327_v62 = vsel %vm133_vm0, %v326_v55, %v310_v54 }
 0x12a   : > { %v296_v61 = vld [vmem:[%s295_s23] sm:$0x1] }
 0x12b   : > { %v287_v63 = vmul.f32 %v286_v59, %v285_v58  ;;  %v297_v0 = vadd.f32 %v296_v61, %v292_v60  ;;  %v298_v1 = vmax.f32 %v292_v60, %v296_v61  ;;  %v313_v2 = vrot.slane %v275_v57, 3 }
 0x12d   : > { %v299_v3 = vmul.f32 %v298_v1, %v297_v0  ;;  %v316_v4 = vrot.slane %v287_v63, 2  ;;  %v329_v5 = vsel %vm328_vm5, %v327_v62, %v313_v2 }
 0x12e   :  { %202 = sbr.rel (!%p200_p6) target bundleno = 270 (0x10e), region = 176 }
 0x12f   : > { %v319_v6 = vrot.slane %v299_v3, 1  ;;  %v331_v7 = vsel %vm330_vm6, %v329_v5, %v316_v4 }
 0x131   : > { %v333_v8 = vsel %vm332_vm7, %v331_v7, %v319_v6 }
 0x132   : > { %335 = vst [vmem:[%s334_s0] sm:$0xff] %v333_v8 }
 0x133 LB: > { %s2090_s26 = sshll.u32 %s1931_s25, 3  ;;  %s341_s25 = sadd.s32 1, %s1931_s25   ;;  %s1931_s25 = sphi %s2084_s25, %s341_s25  }
 0x134   : > { %s363_s27 = sld [smem:[#allocation8 + %s2090_s26]]  ;;  %s343_s4 = scalar_lea.vmem [#allocation2], %s2090_s26 }
 0x135   : > { %v344_v9 = vld [vmem:[%s343_s4] sm:$0xff]  ;;  %s366_s28 = sadd.s32 1, %s2090_s26  ;;  %s370_s1 = sadd.s32 2, %s2090_s26 }
 0x136   : > { %v346_v10 = vrot.slane %v344_v9, 1  ;;  %v348_v11 = vrot.slane %v344_v9, 7  ;;  %s367_s29 = sld [smem:[#allocation8 + %s366_s28]]  ;;  %s374_s30 = sadd.s32 3, %s2090_s26 }
 0x137   : > { %s371_s12 = sld [smem:[#allocation8 + %s370_s1]]  ;;  %s378_s13 = sadd.s32 4, %s2090_s26 }
 0x138   : > { %v351_v12 = vsel %vm321_vm2, %v346_v10, %v348_v11  ;;  %s375_s14 = sld [smem:[#allocation8 + %s374_s30]]  ;;  %s382_s15 = sadd.s32 5, %s2090_s26 }
 0x139   : > { %v353_v13 = vsel %vm323_vm3, %v351_v12, %v346_v10  ;;  %s379_s16 = sld [smem:[#allocation8 + %s378_s13]]  ;;  %s386_s17 = sadd.s32 6, %s2090_s26 }
 0x13a   : > { %v355_v14 = vsel %vm325_vm4, %v353_v13, %v348_v11  ;;  %s383_s18 = sld [smem:[#allocation8 + %s382_s15]]  ;;  %s390_s19 = sadd.s32 7, %s2090_s26 }
 0x13b   : > { %v356_v15 = vsel %vm133_vm0, %v355_v14, %v346_v10  ;;  %s387_s6 = sld [smem:[#allocation8 + %s386_s17]]  ;;  %s364_s20 = scalar_lea.vmem [#allocation4], %s363_s27 }
 0x13c   : > { %s391_s2 = sld [smem:[#allocation8 + %s390_s19]]  ;;  %v365_v16 = vld [vmem:[%s364_s20] sm:$0x1]  ;;  %s368_s5 = scalar_lea.vmem [#allocation4], %s367_s29  ;;  %v358_v18 = vsel %vm328_vm5, %v356_v15, %v348_v11 }
 0x13d   : > { %v369_v17 = vld [vmem:[%s368_s5] sm:$0x1]  ;;  %s372_s21 = scalar_lea.vmem [#allocation4], %s371_s12  ;;  %v360_v26 = vsel %vm330_vm6, %v358_v18, %v346_v10  ;;  %s424_s0 = sshra.s32 %s2090_s26, 3 }
 0x13e   : > { %v373_v19 = vld [vmem:[%s372_s21] sm:$0x1]  ;;  %v395_v20 = vrot.slane %v369_v17, 7  ;;  %s376_s22 = scalar_lea.vmem [#allocation4], %s375_s14  ;;  %v362_v36 = vsel %vm332_vm7, %v360_v26, %v348_v11  ;;  %s1466_s4 = sshll.u32 %s424_s0, 2 }
 0x13f   : > { %v377_v21 = vld [vmem:[%s376_s22] sm:$0x1]  ;;  %v398_v22 = vrot.slane %v373_v19, 6  ;;  %s380_s9 = scalar_lea.vmem [#allocation4], %s379_s16  ;;  %s427_s28 = scalar_lea.vmem [#allocation5], %s1466_s4 }
 0x140   : > { %v381_v23 = vld [vmem:[%s380_s9] sm:$0x1]  ;;  %v401_v24 = vrot.slane %v377_v21, 5  ;;  %v415_v25 = vsel %vm321_vm2, %v365_v16, %v395_v20  ;;  %s384_s23 = scalar_lea.vmem [#allocation4], %s383_s18  ;;  %p338_p7 = scmp.ge.s32.totalorder %s341_s25, 4  }
 0x141   : > { %v385_v27 = vld [vmem:[%s384_s23] sm:$0x1]  ;;  %v404_v28 = vrot.slane %v381_v23, 4  ;;  %v416_v29 = vsel %vm323_vm3, %v415_v25, %v398_v22  ;;  %s388_s24 = scalar_lea.vmem [#allocation4], %s387_s6  ;;  %v1765_v43 = vld [vmem:[#allocation12 + $0x38] sm:$0xff] (%p338_p7)   ;;  %v1766_v44 = vld [vmem:[#allocation12 + $0x30] sm:$0xff] (%p338_p7)  }
 0x142   : > { %v389_v30 = vld [vmem:[%s388_s24] sm:$0x1]  ;;  %v407_v31 = vrot.slane %v385_v27, 3  ;;  %v417_v32 = vsel %vm325_vm4, %v416_v29, %v401_v24  ;;  %s392_s27 = scalar_lea.vmem [#allocation4], %s391_s2  ;;  %1640 = vmatprep.subr.bf16.mxu1 (%p338_p7), %v1765_v43  ;;  %v1767_v45 = vld [vmem:[#allocation12 + $0x28] sm:$0xff] (%p338_p7)   ;;  %v1769_v48 = vld [vmem:[#allocation12 + $0x18] sm:$0xff] (%p338_p7)  }
 0x143   : > { %v393_v33 = vld [vmem:[%s392_s27] sm:$0x1]  ;;  %v410_v34 = vrot.slane %v389_v30, 2  ;;  %v418_v35 = vsel %vm133_vm0, %v417_v32, %v404_v28  ;;  %1641 = vmatpush3.bf16.msra.mxu1 (%p338_p7), %v1765_v43  ;;  %v1770_v49 = vld [vmem:[#allocation12 + $0x10] sm:$0xff] (%p338_p7)   ;;  %v1771_v50 = vld [vmem:[#allocation12 + $0x8] sm:$0xff] (%p338_p7)   ;;  %s2122_s1 = smov (%p338_p7), 0  }
 0x144   : > { %v413_v37 = vrot.slane %v393_v33, 1  ;;  %v419_v38 = vsel %vm328_vm5, %v418_v35, %v407_v31  ;;  %1642 = vmatprep.subr.bf16.mxu1 (%p338_p7), %v1766_v44  ;;  %v1768_v46 = vld [vmem:[#allocation12 + $0x20] sm:$0xff] (%p338_p7)   ;;  %v567_v55 = vld [vmem:[#allocation3 + $0x18] sm:$0xff] (%p338_p7)  ;;  %v565_v58 = vld [vmem:[#allocation3 + $0x10] sm:$0xff] (%p338_p7) }
 0x145   : > { %v420_v39 = vsel %vm330_vm6, %v419_v38, %v410_v34  ;;  %v1772_v51 = vld [vmem:[#allocation12] sm:$0xff] (%p338_p7)   ;;  %v568_v62 = vld [vmem:[#allocation3 + $0x8] sm:$0xff] (%p338_p7) }
 0x146   : > { %v421_v40 = vsel %vm332_vm7, %v420_v39, %v413_v37  ;;  %v1467_v53 = vld [vmem:[%s2242_s7] ss:$0 sm:$0xff] (%p338_p7) }
 0x147   : > { %v422_v41 = vsub.f32 %v421_v40, %v362_v36  ;;  %340 = sbr.rel (!%p338_p7) target bundleno = 307 (0x133), region = 187  ;;  %1643 = vmatpush3.bf16.msra.mxu1 (%p338_p7), %v1766_v44  ;;  %v566_v3 = vld [vmem:[#allocation3] sm:$0xff] (%p338_p7) }
 0x148   :  { %1644 = vmatprep.subr.bf16.mxu1 (%p338_p7), %v1767_v45 }
 0x149   : > { %v423_v42 = vpack.c.bf16 %v422_v41, %v422_v41 }
 0x14b   : > { %428 = vst [vmem:[%s427_s28] sm:$0xf] %v423_v42  ;;  %1645 = vmatpush3.bf16.msra.mxu1 (%p338_p7), %v1767_v45 }
 0x14c   :  { %1646 = vmatprep.subr.bf16.mxu1 %v1768_v46 }
 0x14f   :  { %1647 = vmatpush3.bf16.msra.mxu1 %v1768_v46 }
 0x150   :  { %1648 = vmatprep.subr.bf16.mxu1 %v1769_v48 }
 0x152   :  { %v1773_v47 = vld [vmem:[#allocation5] sm:$0xff]   ;;  %v1774_v52 = vld [vmem:[#allocation5 + $0x8] sm:$0xff]  }
 0x153   :  { %1656 = vmatprep.mubr.bf16.mxu1 %v1773_v47  ;;  %1649 = vmatpush3.bf16.msra.mxu1 %v1769_v48 }
 0x154   :  { %1650 = vmatprep.subr.bf16.mxu1 %v1770_v49 }
 0x157   :  { %1651 = vmatpush3.bf16.msra.mxu1 %v1770_v49 }
 0x158   :  { %1652 = vmatprep.subr.bf16.mxu1 %v1771_v50 }
 0x15b   :  { %1653 = vmatpush3.bf16.msra.mxu1 %v1771_v50 }
 0x15c   :  { %1654 = vmatprep.subr.bf16.mxu1 %v1772_v51 }
 0x15f   :  { %1655 = vmatpush3.bf16.msra.mxu1 %v1772_v51 }
 0x162   :  { %1657 = vmatmul.mubr.bf16.vlgmr.msra.gmra.mxu1 %v1774_v52 }
 0x222   :  { %v1658_v54 = vpop.f32.mrf.mxu1 }
 0x223   :  { %v559_v56 = vadd.f32 %v1658_v54, %v1467_v53 }
 0x224   :  { %v550_v57 = vpop.f32.mrf.mxu1 }
 0x225   :  { %v571_v59 = vadd.f32 %v567_v55, %v559_v56  ;;  %v551_v60 = vadd.f32 %v1467_v53, %v550_v57 }
 0x226   :  { %v1659_v61 = vpop.f32.mrf.mxu1 }
 0x227   :  { %v575_v63 = vmax.f32 %v571_v59, 0.0  ;;  %v569_v0 = vadd.f32 %v565_v58, %v551_v60  ;;  %v562_v1 = vadd.f32 %v1659_v61, %v1467_v53 }
 0x228   :  { %v553_v2 = vpop.f32.mrf.mxu1 }
 0x229   :  { %579 = vst [vmem:[#allocation2 + $0x10] sm:$0xff] %v575_v63  ;;  %v573_v4 = vmax.f32 %v569_v0, 0.0  ;;  %v572_v5 = vadd.f32 %v568_v62, %v562_v1  ;;  %v554_v6 = vadd.f32 %v1467_v53, %v553_v2 }
 0x22b   :  { %577 = vst [vmem:[#allocation2] sm:$0xff] %v573_v4  ;;  %v576_v7 = vmax.f32 %v572_v5, 0.0  ;;  %v570_v8 = vadd.f32 %v566_v3, %v554_v6 }
 0x22d   :  { %580 = vst [vmem:[#allocation2 + $0x18] sm:$0xff] %v576_v7  ;;  %v574_v9 = vmax.f32 %v570_v8, 0.0 }
 0x22f   :  { %578 = vst [vmem:[#allocation2 + $0x8] sm:$0xff] %v574_v9 }
 0x230 LB: > { %s2128_s29 = sshll.u32 %s1935_s1, 4  ;;  %s1935_s1 = sphi %s2122_s1, %s586_s1  }
 0x231   : > { %s589_s30 = sld [smem:[#allocation7 + %s2128_s29]]  ;;  %s592_s12 = sadd.s32 1, %s2128_s29 }
 0x232   : > { %s593_s13 = sld [smem:[#allocation7 + %s592_s12]]  ;;  %s1542_s14 = sadd.s32 2, %s2128_s29 }
 0x233   : > { %s601_s15 = sld [smem:[#allocation7 + %s1542_s14]]  ;;  %s604_s16 = sadd.s32 1, %s1542_s14 }
 0x234   : > { %s605_s17 = sld [smem:[#allocation7 + %s604_s16]]  ;;  %s1544_s18 = sadd.s32 4, %s2128_s29 }
 0x235   : > { %s613_s6 = sld [smem:[#allocation7 + %s1544_s18]]  ;;  %s616_s19 = sadd.s32 1, %s1544_s18 }
 0x236   : > { %s617_s2 = sld [smem:[#allocation7 + %s616_s19]]  ;;  %s1546_s20 = sadd.s32 6, %s2128_s29 }
 0x237   : > { %s625_s5 = sld [smem:[#allocation7 + %s1546_s20]]  ;;  %s590_s21 = scalar_lea.vmem [#allocation2], %s589_s30 }
 0x238   : > { %v591_v10 = vld [vmem:[%s590_s21] sm:$0x1]  ;;  %s628_s22 = sadd.s32 1, %s1546_s20  ;;  %s594_s9 = scalar_lea.vmem [#allocation2], %s593_s13 }
 0x239   : > { %v595_v11 = vld [vmem:[%s594_s9] sm:$0x1]  ;;  %s629_s23 = sld [smem:[#allocation7 + %s628_s22]]  ;;  %s602_s24 = scalar_lea.vmem [#allocation2], %s601_s15 }
 0x23a   : > { %v603_v12 = vld [vmem:[%s602_s24] sm:$0x1]  ;;  %s1548_s0 = sadd.s32 8, %s2128_s29  ;;  %v596_v13 = vadd.f32 %v595_v11, %v591_v10  ;;  %v597_v14 = vmax.f32 %v591_v10, %v595_v11  ;;  %s606_s27 = scalar_lea.vmem [#allocation2], %s605_s17 }
 0x23b   : > { %v607_v15 = vld [vmem:[%s606_s27] sm:$0x1]  ;;  %s637_s4 = sld [smem:[#allocation7 + %s1548_s0]]  ;;  %s614_s28 = scalar_lea.vmem [#allocation2], %s613_s6 }
 0x23c   : > { %v608_v16 = vadd.f32 %v607_v15, %v603_v12  ;;  %v609_v17 = vmax.f32 %v603_v12, %v607_v15  ;;  %v615_v18 = vld [vmem:[%s614_s28] sm:$0x1]  ;;  %s640_s25 = sadd.s32 1, %s1548_s0  ;;  %s618_s26 = scalar_lea.vmem [#allocation2], %s617_s2  ;;  %v598_v24 = vmul.f32 %v597_v14, %v596_v13 }
 0x23d   : > { %v619_v19 = vld [vmem:[%s618_s26] sm:$0x1]  ;;  %s641_s30 = sld [smem:[#allocation7 + %s640_s25]]  ;;  %s626_s12 = scalar_lea.vmem [#allocation2], %s625_s5 }
 0x23e   : > { %v610_v20 = vmul.f32 %v609_v17, %v608_v16  ;;  %v620_v21 = vadd.f32 %v619_v19, %v615_v18  ;;  %v621_v22 = vmax.f32 %v615_v18, %v619_v19  ;;  %v627_v23 = vld [vmem:[%s626_s12] sm:$0x1]  ;;  %s1550_s13 = sadd.s32 10, %s2128_s29  ;;  %s1552_s14 = sadd.s32 12, %s2128_s29 }
 0x23f   : > { %s649_s15 = sld [smem:[#allocation7 + %s1550_s13]]  ;;  %s630_s16 = scalar_lea.vmem [#allocation2], %s629_s23 }
 0x240   : > { %v622_v25 = vmul.f32 %v621_v22, %v620_v21  ;;  %v631_v26 = vld [vmem:[%s630_s16] sm:$0x1]  ;;  %s652_s17 = sadd.s32 1, %s1550_s13  ;;  %s661_s18 = sld [smem:[#allocation7 + %s1552_s14]]  ;;  %v684_v27 = vrot.slane %v610_v20, 7 }
 0x241   : > { %v632_v28 = vadd.f32 %v631_v26, %v627_v23  ;;  %v633_v29 = vmax.f32 %v627_v23, %v631_v26  ;;  %s653_s6 = sld [smem:[#allocation7 + %s652_s17]]  ;;  %s638_s19 = scalar_lea.vmem [#allocation2], %s637_s4 }
 0x242   : > { %v639_v30 = vld [vmem:[%s638_s19] sm:$0x1]  ;;  %s664_s2 = sadd.s32 1, %s1552_s14  ;;  %s1554_s20 = sadd.s32 14, %s2128_s29  ;;  %v687_v31 = vrot.slane %v622_v25, 6  ;;  %v705_v33 = vsel %vm321_vm2, %v598_v24, %v684_v27 }
 0x243   : > { %v634_v32 = vmul.f32 %v633_v29, %v632_v28  ;;  %s665_s5 = sld [smem:[#allocation7 + %s664_s2]]  ;;  %s642_s21 = scalar_lea.vmem [#allocation2], %s641_s30 }
 0x244   : > { %v643_v34 = vld [vmem:[%s642_s21] sm:$0x1]  ;;  %s673_s22 = sld [smem:[#allocation7 + %s1554_s20]]  ;;  %s676_s9 = sadd.s32 1, %s1554_s20  ;;  %v707_v39 = vsel %vm323_vm3, %v705_v33, %v687_v31 }
 0x245   : > { %v644_v35 = vadd.f32 %v643_v34, %v639_v30  ;;  %v645_v36 = vmax.f32 %v639_v30, %v643_v34  ;;  %s677_s23 = sld [smem:[#allocation7 + %s676_s9]]  ;;  %v690_v37 = vrot.slane %v634_v32, 5  ;;  %s650_s24 = scalar_lea.vmem [#allocation2], %s649_s15 }
 0x246   : > { %v651_v38 = vld [vmem:[%s650_s24] sm:$0x1]  ;;  %s662_s29 = scalar_lea.vmem [#allocation2], %s661_s18  ;;  %s1478_s25 = sshll.u32 %s1935_s1, 3 }
 0x247   : > { %v646_v40 = vmul.f32 %v645_v36, %v644_v35  ;;  %s654_s0 = scalar_lea.vmem [#allocation2], %s653_s6  ;;  %v663_v42 = vld [vmem:[%s662_s29] sm:$0x1]  ;;  %v709_v46 = vsel %vm325_vm4, %v707_v39, %v690_v37  ;;  %s717_s26 = scalar_lea.vmem [#allocation4], %s1478_s25 }
 0x248   : > { %v655_v41 = vld [vmem:[%s654_s0] sm:$0x1]  ;;  %s586_s1 = sadd.s32 1, %s1935_s1  }
 0x249   : > { %v656_v43 = vadd.f32 %v655_v41, %v651_v38  ;;  %v657_v44 = vmax.f32 %v651_v38, %v655_v41  ;;  %v693_v45 = vrot.slane %v646_v40, 4  ;;  %s666_s27 = scalar_lea.vmem [#allocation2], %s665_s5  ;;  %p583_p8 = scmp.ge.s32.totalorder %s586_s1, 4  }
 0x24a   : > { %v667_v47 = vld [vmem:[%s666_s27] sm:$0x1]  ;;  %s674_s4 = scalar_lea.vmem [#allocation2], %s673_s22  ;;  %s2150_s30 = smov (%p583_p8), 0  }
 0x24b   : > { %v658_v48 = vmul.f32 %v657_v44, %v656_v43  ;;  %v668_v49 = vadd.f32 %v667_v47, %v663_v42  ;;  %v669_v50 = vmax.f32 %v663_v42, %v667_v47  ;;  %v675_v51 = vld [vmem:[%s674_s4] sm:$0x1]  ;;  %s678_s28 = scalar_lea.vmem [#allocation2], %s677_s23  ;;  %v710_v53 = vsel %vm133_vm0, %v709_v46, %v693_v45 }
 0x24c   : > { %v679_v52 = vld [vmem:[%s678_s28] sm:$0x1] }
 0x24d   : > { %v670_v54 = vmul.f32 %v669_v50, %v668_v49  ;;  %v680_v55 = vadd.f32 %v679_v52, %v675_v51  ;;  %v681_v56 = vmax.f32 %v675_v51, %v679_v52  ;;  %v696_v57 = vrot.slane %v658_v48, 3 }
 0x24f   : > { %v682_v58 = vmul.f32 %v681_v56, %v680_v55  ;;  %v699_v59 = vrot.slane %v670_v54, 2  ;;  %v712_v60 = vsel %vm328_vm5, %v710_v53, %v696_v57 }
 0x250   :  { %585 = sbr.rel (!%p583_p8) target bundleno = 560 (0x230), region = 198 }
 0x251   : > { %v702_v61 = vrot.slane %v682_v58, 1  ;;  %v714_v62 = vsel %vm330_vm6, %v712_v60, %v699_v59 }
 0x253   : > { %v716_v63 = vsel %vm332_vm7, %v714_v62, %v702_v61 }
 0x254   : > { %718 = vst [vmem:[%s717_s26] sm:$0xff] %v716_v63 }
 0x255 LB: > { %s2156_s12 = sshll.u32 %s1939_s30, 3  ;;  %s724_s30 = sadd.s32 1, %s1939_s30   ;;  %s1939_s30 = sphi %s2150_s30, %s724_s30  }
 0x256   : > { %s746_s13 = sld [smem:[#allocation8 + %s2156_s12]]  ;;  %s726_s1 = scalar_lea.vmem [#allocation2], %s2156_s12 }
 0x257   : > { %v727_v0 = vld [vmem:[%s726_s1] sm:$0xff]  ;;  %s749_s14 = sadd.s32 1, %s2156_s12  ;;  %s753_s15 = sadd.s32 2, %s2156_s12 }
 0x258   : > { %v729_v1 = vrot.slane %v727_v0, 1  ;;  %v731_v2 = vrot.slane %v727_v0, 7  ;;  %s750_s16 = sld [smem:[#allocation8 + %s749_s14]]  ;;  %s757_s17 = sadd.s32 3, %s2156_s12 }
 0x259   : > { %s754_s18 = sld [smem:[#allocation8 + %s753_s15]]  ;;  %s761_s6 = sadd.s32 4, %s2156_s12 }
 0x25a   : > { %v734_v3 = vsel %vm321_vm2, %v729_v1, %v731_v2  ;;  %s758_s19 = sld [smem:[#allocation8 + %s757_s17]]  ;;  %s765_s2 = sadd.s32 5, %s2156_s12 }
 0x25b   : > { %v736_v4 = vsel %vm323_vm3, %v734_v3, %v729_v1  ;;  %s762_s20 = sld [smem:[#allocation8 + %s761_s6]]  ;;  %s769_s5 = sadd.s32 6, %s2156_s12 }
 0x25c   : > { %v738_v5 = vsel %vm325_vm4, %v736_v4, %v731_v2  ;;  %s766_s21 = sld [smem:[#allocation8 + %s765_s2]]  ;;  %s773_s9 = sadd.s32 7, %s2156_s12 }
 0x25d   : > { %v739_v6 = vsel %vm133_vm0, %v738_v5, %v729_v1  ;;  %s770_s22 = sld [smem:[#allocation8 + %s769_s5]]  ;;  %s747_s24 = scalar_lea.vmem [#allocation4], %s746_s13 }
 0x25e   : > { %s774_s23 = sld [smem:[#allocation8 + %s773_s9]]  ;;  %v748_v7 = vld [vmem:[%s747_s24] sm:$0x1]  ;;  %s751_s0 = scalar_lea.vmem [#allocation4], %s750_s16  ;;  %v741_v9 = vsel %vm328_vm5, %v739_v6, %v731_v2 }
 0x25f   : > { %v752_v8 = vld [vmem:[%s751_s0] sm:$0x1]  ;;  %s755_s29 = scalar_lea.vmem [#allocation4], %s754_s18  ;;  %v743_v17 = vsel %vm330_vm6, %v741_v9, %v729_v1  ;;  %s807_s26 = sshra.s32 %s2156_s12, 3 }
 0x260   : > { %v756_v10 = vld [vmem:[%s755_s29] sm:$0x1]  ;;  %v778_v11 = vrot.slane %v752_v8, 7  ;;  %s759_s27 = scalar_lea.vmem [#allocation4], %s758_s19  ;;  %v745_v27 = vsel %vm332_vm7, %v743_v17, %v731_v2  ;;  %s1488_s1 = sshll.u32 %s807_s26, 2 }
 0x261   : > { %v760_v12 = vld [vmem:[%s759_s27] sm:$0x1]  ;;  %v781_v13 = vrot.slane %v756_v10, 6  ;;  %s763_s4 = scalar_lea.vmem [#allocation4], %s762_s20  ;;  %s810_s14 = scalar_lea.vmem [#allocation5], %s1488_s1 }
 0x262   : > { %v764_v14 = vld [vmem:[%s763_s4] sm:$0x1]  ;;  %v784_v15 = vrot.slane %v760_v12, 5  ;;  %v798_v16 = vsel %vm321_vm2, %v748_v7, %v778_v11  ;;  %s767_s28 = scalar_lea.vmem [#allocation4], %s766_s21  ;;  %p721_p9 = scmp.ge.s32.totalorder %s724_s30, 4  }
 0x263   : > { %v768_v18 = vld [vmem:[%s767_s28] sm:$0x1]  ;;  %v787_v19 = vrot.slane %v764_v14, 4  ;;  %v799_v20 = vsel %vm323_vm3, %v798_v16, %v781_v13  ;;  %s771_s25 = scalar_lea.vmem [#allocation4], %s770_s22  ;;  %v1775_v34 = vld [vmem:[#allocation12 + $0x78] sm:$0xff] (%p721_p9)   ;;  %v1776_v35 = vld [vmem:[#allocation12 + $0x70] sm:$0xff] (%p721_p9)  }
 0x264   : > { %v772_v21 = vld [vmem:[%s771_s25] sm:$0x1]  ;;  %v790_v22 = vrot.slane %v768_v18, 3  ;;  %v800_v23 = vsel %vm325_vm4, %v799_v20, %v784_v15  ;;  %s775_s13 = scalar_lea.vmem [#allocation4], %s774_s23  ;;  %1660 = vmatprep.subr.bf16.mxu0 (%p721_p9), %v1775_v34  ;;  %v1777_v36 = vld [vmem:[#allocation12 + $0x68] sm:$0xff] (%p721_p9)   ;;  %v1779_v39 = vld [vmem:[#allocation12 + $0x58] sm:$0xff] (%p721_p9)  }
 0x265   : > { %v776_v24 = vld [vmem:[%s775_s13] sm:$0x1]  ;;  %v793_v25 = vrot.slane %v772_v21, 2  ;;  %v801_v26 = vsel %vm133_vm0, %v800_v23, %v787_v19  ;;  %1661 = vmatpush3.bf16.msra.mxu0 (%p721_p9), %v1775_v34  ;;  %v1780_v40 = vld [vmem:[#allocation12 + $0x50] sm:$0xff] (%p721_p9)   ;;  %v1781_v41 = vld [vmem:[#allocation12 + $0x48] sm:$0xff] (%p721_p9)  }
 0x266   : > { %v796_v28 = vrot.slane %v776_v24, 1  ;;  %v802_v29 = vsel %vm328_vm5, %v801_v26, %v790_v22  ;;  %1662 = vmatprep.subr.bf16.mxu0 (%p721_p9), %v1776_v35  ;;  %v1778_v37 = vld [vmem:[#allocation12 + $0x60] sm:$0xff] (%p721_p9)   ;;  %v952_v46 = vld [vmem:[#allocation3 + $0x18] sm:$0xff] (%p721_p9)  ;;  %v950_v49 = vld [vmem:[#allocation3 + $0x10] sm:$0xff] (%p721_p9) }
 0x267   : > { %v803_v30 = vsel %vm330_vm6, %v802_v29, %v793_v25  ;;  %v1782_v42 = vld [vmem:[#allocation12 + $0x40] sm:$0xff] (%p721_p9)   ;;  %v953_v53 = vld [vmem:[#allocation3 + $0x8] sm:$0xff] (%p721_p9) }
 0x268   : > { %v804_v31 = vsel %vm332_vm7, %v803_v30, %v796_v28  ;;  %v1490_v44 = vld [vmem:[%s2242_s7 + $0x1] ss:$0 sm:$0xff] (%p721_p9)  ;;  %s2188_s7 = smov (%p721_p9), 0  }
 0x269   : > { %v805_v32 = vsub.f32 %v804_v31, %v745_v27  ;;  %723 = sbr.rel (!%p721_p9) target bundleno = 597 (0x255), region = 209  ;;  %1663 = vmatpush3.bf16.msra.mxu0 (%p721_p9), %v1776_v35  ;;  %v951_v58 = vld [vmem:[#allocation3] sm:$0xff] (%p721_p9) }
 0x26a   :  { %1664 = vmatprep.subr.bf16.mxu0 (%p721_p9), %v1777_v36 }
 0x26b   : > { %v806_v33 = vpack.c.bf16 %v805_v32, %v805_v32 }
 0x26d   : > { %811 = vst [vmem:[%s810_s14] sm:$0xf] %v806_v33  ;;  %1665 = vmatpush3.bf16.msra.mxu0 (%p721_p9), %v1777_v36 }
 0x26e   :  { %1666 = vmatprep.subr.bf16.mxu0 %v1778_v37 }
 0x271   :  { %1667 = vmatpush3.bf16.msra.mxu0 %v1778_v37 }
 0x272   :  { %1668 = vmatprep.subr.bf16.mxu0 %v1779_v39 }
 0x274   :  { %v1783_v38 = vld [vmem:[#allocation5] sm:$0xff]   ;;  %v1784_v43 = vld [vmem:[#allocation5 + $0x8] sm:$0xff]  }
 0x275   :  { %1676 = vmatprep.mubr.bf16.mxu0 %v1783_v38  ;;  %1669 = vmatpush3.bf16.msra.mxu0 %v1779_v39 }
 0x276   :  { %1670 = vmatprep.subr.bf16.mxu0 %v1780_v40 }
 0x279   :  { %1671 = vmatpush3.bf16.msra.mxu0 %v1780_v40 }
 0x27a   :  { %1672 = vmatprep.subr.bf16.mxu0 %v1781_v41 }
 0x27d   :  { %1673 = vmatpush3.bf16.msra.mxu0 %v1781_v41 }
 0x27e   :  { %1674 = vmatprep.subr.bf16.mxu0 %v1782_v42 }
 0x281   :  { %1675 = vmatpush3.bf16.msra.mxu0 %v1782_v42 }
 0x284   :  { %1677 = vmatmul.mubr.bf16.vlgmr.msra.gmra.mxu0 %v1784_v43 }
 0x344   :  { %v1678_v45 = vpop.f32.mrf.mxu0 }
 0x345   :  { %v944_v47 = vadd.f32 %v1678_v45, %v1490_v44 }
 0x346   :  { %v935_v48 = vpop.f32.mrf.mxu0 }
 0x347   :  { %v956_v50 = vadd.f32 %v952_v46, %v944_v47  ;;  %v936_v51 = vadd.f32 %v1490_v44, %v935_v48 }
 0x348   :  { %v1679_v52 = vpop.f32.mrf.mxu0 }
 0x349   :  { %v960_v54 = vmax.f32 %v956_v50, 0.0  ;;  %v954_v55 = vadd.f32 %v950_v49, %v936_v51  ;;  %v947_v56 = vadd.f32 %v1679_v52, %v1490_v44 }
 0x34a   :  { %v938_v57 = vpop.f32.mrf.mxu0 }
 0x34b   :  { %964 = vst [vmem:[#allocation2 + $0x10] sm:$0xff] %v960_v54  ;;  %v958_v59 = vmax.f32 %v954_v55, 0.0  ;;  %v957_v60 = vadd.f32 %v953_v53, %v947_v56  ;;  %v939_v61 = vadd.f32 %v1490_v44, %v938_v57 }
 0x34d   :  { %962 = vst [vmem:[#allocation2] sm:$0xff] %v958_v59  ;;  %v961_v62 = vmax.f32 %v957_v60, 0.0  ;;  %v955_v63 = vadd.f32 %v951_v58, %v939_v61 }
 0x34f   :  { %965 = vst [vmem:[#allocation2 + $0x18] sm:$0xff] %v961_v62  ;;  %v959_v0 = vmax.f32 %v955_v63, 0.0 }
 0x351   :  { %963 = vst [vmem:[#allocation2 + $0x8] sm:$0xff] %v959_v0 }
 0x352 LB: > { %s2194_s15 = sshll.u32 %s1943_s7, 4  ;;  %s1943_s7 = sphi %s2188_s7, %s971_s7  }
 0x353   : > { %s974_s16 = sld [smem:[#allocation7 + %s2194_s15]]  ;;  %s977_s17 = sadd.s32 1, %s2194_s15 }
 0x354   : > { %s978_s18 = sld [smem:[#allocation7 + %s977_s17]]  ;;  %s1557_s6 = sadd.s32 2, %s2194_s15 }
 0x355   : > { %s986_s19 = sld [smem:[#allocation7 + %s1557_s6]]  ;;  %s989_s2 = sadd.s32 1, %s1557_s6 }
 0x356   : > { %s990_s20 = sld [smem:[#allocation7 + %s989_s2]]  ;;  %s1559_s5 = sadd.s32 4, %s2194_s15 }
 0x357   : > { %s998_s21 = sld [smem:[#allocation7 + %s1559_s5]]  ;;  %s1001_s22 = sadd.s32 1, %s1559_s5 }
 0x358   : > { %s1002_s9 = sld [smem:[#allocation7 + %s1001_s22]]  ;;  %s1561_s23 = sadd.s32 6, %s2194_s15 }
 0x359   : > { %s1010_s24 = sld [smem:[#allocation7 + %s1561_s23]]  ;;  %s975_s0 = scalar_lea.vmem [#allocation2], %s974_s16 }
 0x35a   : > { %v976_v1 = vld [vmem:[%s975_s0] sm:$0x1]  ;;  %s1013_s29 = sadd.s32 1, %s1561_s23  ;;  %s979_s27 = scalar_lea.vmem [#allocation2], %s978_s18 }
 0x35b   : > { %v980_v2 = vld [vmem:[%s979_s27] sm:$0x1]  ;;  %s1014_s4 = sld [smem:[#allocation7 + %s1013_s29]]  ;;  %s987_s28 = scalar_lea.vmem [#allocation2], %s986_s19 }
 0x35c   : > { %v988_v3 = vld [vmem:[%s987_s28] sm:$0x1]  ;;  %s1563_s25 = sadd.s32 8, %s2194_s15  ;;  %v981_v4 = vadd.f32 %v980_v2, %v976_v1  ;;  %v982_v5 = vmax.f32 %v976_v1, %v980_v2  ;;  %s991_s26 = scalar_lea.vmem [#allocation2], %s990_s20 }
 0x35d   : > { %v992_v6 = vld [vmem:[%s991_s26] sm:$0x1]  ;;  %s1022_s13 = sld [smem:[#allocation7 + %s1563_s25]]  ;;  %s999_s1 = scalar_lea.vmem [#allocation2], %s998_s21 }
 0x35e   : > { %v993_v7 = vadd.f32 %v992_v6, %v988_v3  ;;  %v994_v8 = vmax.f32 %v988_v3, %v992_v6  ;;  %v1000_v9 = vld [vmem:[%s999_s1] sm:$0x1]  ;;  %s1025_s14 = sadd.s32 1, %s1563_s25  ;;  %s1003_s30 = scalar_lea.vmem [#allocation2], %s1002_s9  ;;  %v983_v15 = vmul.f32 %v982_v5, %v981_v4 }
 0x35f   : > { %v1004_v10 = vld [vmem:[%s1003_s30] sm:$0x1]  ;;  %s1026_s12 = sld [smem:[#allocation7 + %s1025_s14]]  ;;  %s1011_s16 = scalar_lea.vmem [#allocation2], %s1010_s24 }
 0x360   : > { %v995_v11 = vmul.f32 %v994_v8, %v993_v7  ;;  %v1005_v12 = vadd.f32 %v1004_v10, %v1000_v9  ;;  %v1006_v13 = vmax.f32 %v1000_v9, %v1004_v10  ;;  %v1012_v14 = vld [vmem:[%s1011_s16] sm:$0x1]  ;;  %s1565_s17 = sadd.s32 10, %s2194_s15  ;;  %s1567_s18 = sadd.s32 12, %s2194_s15 }
 0x361   : > { %s1034_s6 = sld [smem:[#allocation7 + %s1565_s17]]  ;;  %s1015_s19 = scalar_lea.vmem [#allocation2], %s1014_s4 }
 0x362   : > { %v1007_v16 = vmul.f32 %v1006_v13, %v1005_v12  ;;  %v1016_v17 = vld [vmem:[%s1015_s19] sm:$0x1]  ;;  %s1037_s2 = sadd.s32 1, %s1565_s17  ;;  %s1046_s20 = sld [smem:[#allocation7 + %s1567_s18]]  ;;  %v1069_v18 = vrot.slane %v995_v11, 7 }
 0x363   : > { %v1017_v19 = vadd.f32 %v1016_v17, %v1012_v14  ;;  %v1018_v20 = vmax.f32 %v1012_v14, %v1016_v17  ;;  %s1038_s5 = sld [smem:[#allocation7 + %s1037_s2]]  ;;  %s1023_s21 = scalar_lea.vmem [#allocation2], %s1022_s13 }
 0x364   : > { %v1024_v21 = vld [vmem:[%s1023_s21] sm:$0x1]  ;;  %s1049_s22 = sadd.s32 1, %s1567_s18  ;;  %s1569_s9 = sadd.s32 14, %s2194_s15  ;;  %v1072_v22 = vrot.slane %v1007_v16, 6  ;;  %v1090_v24 = vsel %vm321_vm2, %v983_v15, %v1069_v18 }
 0x365   : > { %v1019_v23 = vmul.f32 %v1018_v20, %v1017_v19  ;;  %s1050_s23 = sld [smem:[#allocation7 + %s1049_s22]]  ;;  %s1027_s24 = scalar_lea.vmem [#allocation2], %s1026_s12 }
 0x366   : > { %v1028_v25 = vld [vmem:[%s1027_s24] sm:$0x1]  ;;  %s1058_s0 = sld [smem:[#allocation7 + %s1569_s9]]  ;;  %s1061_s29 = sadd.s32 1, %s1569_s9  ;;  %v1092_v30 = vsel %vm323_vm3, %v1090_v24, %v1072_v22 }
 0x367   : > { %v1029_v26 = vadd.f32 %v1028_v25, %v1024_v21  ;;  %v1030_v27 = vmax.f32 %v1024_v21, %v1028_v25  ;;  %s1062_s27 = sld [smem:[#allocation7 + %s1061_s29]]  ;;  %v1075_v28 = vrot.slane %v1019_v23, 5  ;;  %s1035_s4 = scalar_lea.vmem [#allocation2], %s1034_s6 }
 0x368   : > { %v1036_v29 = vld [vmem:[%s1035_s4] sm:$0x1]  ;;  %s1047_s15 = scalar_lea.vmem [#allocation2], %s1046_s20  ;;  %s1501_s1 = sshll.u32 %s1943_s7, 3 }
 0x369   : > { %v1031_v31 = vmul.f32 %v1030_v27, %v1029_v26  ;;  %s1039_s28 = scalar_lea.vmem [#allocation2], %s1038_s5  ;;  %v1048_v33 = vld [vmem:[%s1047_s15] sm:$0x1]  ;;  %v1094_v37 = vsel %vm325_vm4, %v1092_v30, %v1075_v28  ;;  %s1102_s14 = scalar_lea.vmem [#allocation4], %s1501_s1 }
 0x36a   : > { %v1040_v32 = vld [vmem:[%s1039_s28] sm:$0x1]  ;;  %s971_s7 = sadd.s32 1, %s1943_s7  }
 0x36b   : > { %v1041_v34 = vadd.f32 %v1040_v32, %v1036_v29  ;;  %v1042_v35 = vmax.f32 %v1036_v29, %v1040_v32  ;;  %v1078_v36 = vrot.slane %v1031_v31, 4  ;;  %s1051_s25 = scalar_lea.vmem [#allocation2], %s1050_s23  ;;  %p968_p10 = scmp.ge.s32.totalorder %s971_s7, 4  }
 0x36c   : > { %v1052_v38 = vld [vmem:[%s1051_s25] sm:$0x1]  ;;  %s1059_s26 = scalar_lea.vmem [#allocation2], %s1058_s0  ;;  %v1785_v55 = vld [vmem:[#allocation14 + $0x38] sm:$0xff] (%p968_p10)   ;;  %v1786_v56 = vld [vmem:[#allocation14 + $0x30] sm:$0xff] (%p968_p10)   ;;  %vm1249_vm8 = vcmask (%p968_p10), 195584  }
 0x36d   : > { %v1043_v39 = vmul.f32 %v1042_v35, %v1041_v34  ;;  %v1053_v40 = vadd.f32 %v1052_v38, %v1048_v33  ;;  %v1054_v41 = vmax.f32 %v1048_v33, %v1052_v38  ;;  %v1060_v42 = vld [vmem:[%s1059_s26] sm:$0x1]  ;;  %s1063_s13 = scalar_lea.vmem [#allocation2], %s1062_s27  ;;  %v1095_v44 = vsel %vm133_vm0, %v1094_v37, %v1078_v36  ;;  %1680 = vmatprep.subr.bf16.mxu1 (%p968_p10), %v1785_v55  ;;  %v1787_v57 = vld [vmem:[#allocation14 + $0x28] sm:$0xff] (%p968_p10)   ;;  %v1789_v1 = vld [vmem:[#allocation14 + $0x18] sm:$0xff] (%p968_p10)   ;;  %s1952_s2 = smov (%p968_p10), [#allocation15]  }
 0x36e   : > { %v1064_v43 = vld [vmem:[%s1063_s13] sm:$0x1]  ;;  %1681 = vmatpush3.bf16.msra.mxu1 (%p968_p10), %v1785_v55  ;;  %v1790_v58 = vld [vmem:[%s2243_s8 + $0x8] ss:$0 sps:$4 sm:$0xff] (%p968_p10)   ;;  %v1791_v4 = vld [vmem:[#allocation14 + $0x10] sm:$0xff] (%p968_p10)   ;;  %s1332_s20 = sshll.u32 (%p968_p10), %s1952_s2, 4  ;;  %s1333_s20 = int_to_ptr.vmem [resolvable:$true] %s1332_s20 }
 0x36f   : > { %v1055_v45 = vmul.f32 %v1054_v41, %v1053_v40  ;;  %v1065_v46 = vadd.f32 %v1064_v43, %v1060_v42  ;;  %v1066_v47 = vmax.f32 %v1060_v42, %v1064_v43  ;;  %v1081_v48 = vrot.slane %v1043_v39, 3  ;;  %1682 = vmatprep.subr.bf16.mxu1 (%p968_p10), %v1786_v56  ;;  %1709 = vmatprep.subr.msk.bf16.mxu0 (%p968_p10), %vm133_vm0, %v1790_v58  ;;  %v1792_v60 = vld [vmem:[%s2243_s8] sm:$0xff] (%p968_p10)   ;;  %v1795_v63 = vld [vmem:[%s2238_s3 + $0x8] sm:$0xff] (%p968_p10)   ;;  %p1882_p12 = scmp.lt.s32.totalorder (%p968_p10), %s1333_s20, %s1333_s20 }
 0x370   :  { %v1257_v59 = vsel (%p968_p10), %vm133_vm0, %v1790_v58, 0  ;;  %v1788_v61 = vld [vmem:[#allocation14 + $0x20] sm:$0xff] (%p968_p10)   ;;  %v1793_v5 = vld [vmem:[#allocation14 + $0x8] sm:$0xff] (%p968_p10)  }
 0x371   : > { %v1067_v49 = vmul.f32 %v1066_v47, %v1065_v46  ;;  %v1084_v50 = vrot.slane %v1055_v45, 2  ;;  %v1097_v51 = vsel %vm328_vm5, %v1095_v44, %v1081_v48  ;;  %1701 = vmatpush3.bf16.msra.mxu0 (%p968_p10), %v1257_v59  ;;  %v1794_v62 = vld [vmem:[%s2238_s3] sm:$0xff] (%p968_p10)  }
 0x372   :  { %970 = sbr.rel (!%p968_p10) target bundleno = 850 (0x352), region = 220  ;;  %1683 = vmatpush3.bf16.msra.mxu1 (%p968_p10), %v1786_v56  ;;  %1702 = vmatprep.subr.bf16.mxu0 (%p968_p10), %v1792_v60  ;;  %v1796_v6 = vld [vmem:[#allocation14] sm:$0xff] (%p968_p10)  }
 0x373   : > { %v1087_v52 = vrot.slane %v1067_v49, 1  ;;  %v1099_v53 = vsel %vm330_vm6, %v1097_v51, %v1084_v50  ;;  %1684 = vmatprep.subr.bf16.mxu1 (%p968_p10), %v1787_v57  ;;  %1704 = vmatprep.mubr.msk.bf16.mxu0 (%p968_p10), %vm1249_vm8, %v1794_v62  ;;  %v1524_v13 = vld [vmem:[%s2245_s10] ss:$0 sm:$0xff] (%p968_p10)  ;;  %s1877_s10 = scalar_lea.vmem (%p968_p10), %s1333_s20, 512 }
 0x374   :  { %p1878_p11 = scmp.ne.s32.totalorder (%p968_p10), %s1333_s20, %s1877_s10  ;;  %p1883_p13 = scmp.lt.s32.totalorder (%p968_p10), %s1877_s10, %s1877_s10 }
 0x375   : > { %v1101_v54 = vsel %vm332_vm7, %v1099_v53, %v1087_v52  ;;  %1703 = vmatpush3.bf16.msra.mxu0 (%p968_p10), %v1792_v60 }
 0x376   : > { %1103 = vst [vmem:[%s1102_s14] sm:$0xff] %v1101_v54  ;;  %1685 = vmatpush3.bf16.msra.mxu1 (%p968_p10), %v1787_v57  ;;  %p1884_p0 = por (%p968_p10), %p1883_p13, %p1882_p12 }
 0x377   :  { %1686 = vmatprep.subr.bf16.mxu1 %v1788_v61 }
 0x378   :  { %1705 = vmatmul.mubr.msk.bf16.vlgmr.msra.gmra.mxu0 %vm1249_vm8, %v1795_v63  ;;  %p1885_p1 = pnand %p1884_p0, %p1878_p11 }
 0x37a   :  { %1687 = vmatpush3.bf16.msra.mxu1 %v1788_v61 }
 0x37b   :  { %1688 = vmatprep.subr.bf16.mxu1 %v1789_v1 }
 0x37d   :  { %v1111_v0 = vld [vmem:[#allocation4] sm:$0xff]  ;;  %v1112_v2 = vld [vmem:[#allocation4 + $0x8] sm:$0xff]  ;;  %v1113_v7 = vld [vmem:[#allocation4 + $0x10] sm:$0xff] }
 0x37e   :  { %v1115_v3 = vpack.c.bf16 %v1112_v2, %v1111_v0  ;;  %1689 = vmatpush3.bf16.msra.mxu1 %v1789_v1  ;;  %v1114_v8 = vld [vmem:[#allocation4 + $0x18] sm:$0xff] }
 0x37f   :  { %1690 = vmatprep.subr.bf16.mxu1 %v1791_v4  ;;  %v1116_v9 = vpack.c.bf16 %v1114_v8, %v1113_v7 }
 0x380   :  { %1696 = vmatprep.mubr.bf16.mxu1 %v1115_v3 }
 0x382   :  { %1691 = vmatpush3.bf16.msra.mxu1 %v1791_v4 }
 0x383   :  { %1692 = vmatprep.subr.bf16.mxu1 %v1793_v5 }
 0x386   :  { %1693 = vmatpush3.bf16.msra.mxu1 %v1793_v5 }
 0x387   :  { %1694 = vmatprep.subr.bf16.mxu1 %v1796_v6 }
 0x38a   :  { %1695 = vmatpush3.bf16.msra.mxu1 %v1796_v6 }
 0x38d   :  { %1697 = vmatmul.mubr.bf16.vlgmr.msra.gmra.mxu1 %v1116_v9 }
 0x438   :  { %v1706_v10 = vpop.f32.mrf.mxu0 }
 0x43a   :  { %v1293_v11 = vpop.f32.mrf.mxu0 }
 0x43c   :  { %v1707_v15 = vpop.f32.mrf.mxu0 }
 0x43e   :  { %v1296_v23 = vpop.f32.mrf.mxu0 }
 0x44d   :  { %v1698_v12 = vpop.f32.mrf.mxu1 }
 0x44e   :  { %v1302_v14 = vadd.f32 %v1706_v10, %v1698_v12 }
 0x44f   :  { %v1215_v16 = vpop.f32.mrf.mxu1 }
 0x450   :  { %v1317_v17 = vadd.f32 %v1524_v13, %v1302_v14  ;;  %v1294_v18 = vadd.f32 %v1293_v11, %v1215_v16 }
 0x451   :  { %v1699_v19 = vpop.f32.mrf.mxu1 }
 0x452   :  { %v1321_v20 = vmax.f32 %v1317_v17, 0.0  ;;  %v1315_v21 = vadd.f32 %v1524_v13, %v1294_v18  ;;  %v1305_v22 = vadd.f32 %v1707_v15, %v1699_v19 }
 0x453   :  { %v1218_v24 = vpop.f32.mrf.mxu1 }
 0x454   :  { %1325 = vst [vmem:[#allocation15 + $0x10] sm:$0xff] %v1321_v20  ;;  %v1319_v25 = vmax.f32 %v1315_v21, 0.0  ;;  %v1318_v26 = vadd.f32 %v1524_v13, %v1305_v22  ;;  %v1297_v27 = vadd.f32 %v1296_v23, %v1218_v24 }
 0x456   :  { %1323 = vst [vmem:[#allocation15] sm:$0xff] %v1319_v25  ;;  %v1322_v28 = vmax.f32 %v1318_v26, 0.0  ;;  %v1316_v29 = vadd.f32 %v1524_v13, %v1297_v27 }
 0x458   :  { %1326 = vst [vmem:[#allocation15 + $0x18] sm:$0xff] %v1322_v28  ;;  %v1320_v30 = vmax.f32 %v1316_v29, 0.0 }
 0x45a   :  { %1324 = vst [vmem:[#allocation15 + $0x8] sm:$0xff] %v1320_v30 }
 0x45b   :  { %1888 = shalt.err (!%p1885_p1)
}
 0x45c   :  { %s1953_s5 = smov 128   ;;  %s1954_s21 = smov 8  }
 0x45d   :  { %1338 = dma.vmem_to_hbm [thread:$0]  %s1333_s20, 512, %s2246_s11, [#allocation11], %s1953_s5, %s1953_s5, %s1954_s21  }
 0x45e   :  { %1923 = dma.done.wait [#allocation11], 512  }
 0x45f   :  { %1924 = vsyncadd [#allocation11], 4294966784 }
 0x460   :  { %1342 = vsyncpa [#allocation10], 1 }
 0x461   :  { %1343 = vsyncpa [#allocation13], 1 }
 0x462   :  { %1344 = vsyncpa [#allocation11], 1 }

</bundles_post_ra>
